<compile_context>
chip_gen: v7x
topology: tpu7x:2x2x1
jax: 0.10.0
libtpu: 0.0.40
codegen_flags: <defaults>
</compile_context>

<pallas_src>
import numpy as np
import jax
import jax.numpy as jnp
from jax.experimental import pallas as pl
from jax.experimental.pallas import tpu as pltpu

_BN_EPS = 1e-5


# ---------------------------------------------------------------------------
# Host-side (numpy) interpolation / padding matrices
# ---------------------------------------------------------------------------

def _interp_matrix_1d(n_in, n_out):
    """1-D bilinear interpolation matrix, align_corners=True (PyTorch Upsample)."""
    A = np.zeros((n_out, n_in), dtype=np.float32)
    if n_in == 1:
        A[:, 0] = 1.0
        return A
    scale = (n_in - 1) / (n_out - 1)
    for o in range(n_out):
        src = o * scale
        i0 = min(int(np.floor(src)), n_in - 1)
        i1 = min(i0 + 1, n_in - 1)
        w = src - i0
        A[o, i0] += 1.0 - w
        A[o, i1] += w
    return A


def _axis_matrix(n_in, n_out_target):
    """x2 bilinear upsample along one axis, then replicate-pad to n_out_target."""
    A = _interp_matrix_1d(n_in, 2 * n_in)
    d = n_out_target - 2 * n_in
    if d < 0:
        # TODO(synk): negative pad (crop) of F.pad is not supported.
        raise NotImplementedError("x2 spatially smaller than upsampled x1")
    if d > 0:  # F.pad(..., 'replicate') folded into the interpolation matrix
        lo, hi = d // 2, d - d // 2
        A = np.concatenate([np.repeat(A[:1], lo, axis=0), A,
                            np.repeat(A[-1:], hi, axis=0)], axis=0)
    return A


def _upsample_matrix(h, w, H, W):
    """(h*w, H*W) spatial matrix M with x1u[c, p] = x1[c, :] @ M[:, p].

    Channels never enter this matrix (no kron with I_C); its size is purely
    spatial, 32 KiB in bf16 at the demo size.
    """
    Ah = _axis_matrix(h, H)          # (H, h)
    Aw = _axis_matrix(w, W)          # (W, w)
    return np.kron(Ah, Aw).T.astype(np.float32)   # (h*w, H*W)


# ---------------------------------------------------------------------------
# Fused Pallas kernel: upsample + concat + (conv3x3 -> BN -> ReLU) * 2
# ---------------------------------------------------------------------------

def _make_up_kernel(W, P):
    """Builds the per-image kernel. Activations live channels-major (C, P)."""

    def shift_lanes(x, s):
        """y[:, p] = x[:, p + s] for 0 <= p + s < P, else 0 (static s)."""
        if s == 0:
            return x
        rows = x.shape[0]
        pad = jnp.zeros((rows, abs(s)), dtype=x.dtype)
        if s > 0:
            return jnp.concatenate([x[:, s:], pad], axis=1)
        return jnp.concatenate([pad, x[:, :P + s]], axis=1)

    def im2col(x):
        """x: (Cin, P) bf16 -> (9*Cin, P) bf16, zero-padded 3x3 neighborhoods."""
        col = jax.lax.broadcasted_iota(jnp.int32, (1, P), 1) % W
        # Hoisted border masks: reused across the three dy values of each dx.
        x_zc0 = jnp.where(col != 0, x, jnp.zeros_like(x))        # for dx == +1
        x_zcL = jnp.where(col != W - 1, x, jnp.zeros_like(x))    # for dx == -1
        taps = []
        for ky in range(3):
            for kx in range(3):
                dy, dx = ky - 1, kx - 1
                src = x if dx == 0 else (x_zc0 if dx == 1 else x_zcL)
                taps.append(shift_lanes(src, dy * W + dx))
        return jnp.concatenate(taps, axis=0)

    def kernel(x1_ref, x2_ref, bup_ref, w1t_ref, s1_ref, b1_ref,
               w2t_ref, s2_ref, b2_ref, o_ref):
        # 1) bilinear x2 upsample (+ replicate pad), folded into one matmul:
        #    (C1, h*w) @ (h*w, P) -> (C1, P), bf16 in / f32 acc.
        x1u = jnp.dot(x1_ref[0], bup_ref[...],
                      preferred_element_type=jnp.float32).astype(jnp.bfloat16)
        # 2) channel concat in VMEM (x2 first, matching torch.cat([x2, x1], 1)).
        x = jnp.concatenate([x2_ref[0], x1u], axis=0)             # (C2+C1, P)
        # 3) conv1 as ONE matmul: (Cmid, 9*Cin) @ (9*Cin, P); fused BN + ReLU.
        a1 = jnp.dot(w1t_ref[...], im2col(x),
                     preferred_element_type=jnp.float32)          # (Cmid, P) f32
        y1 = jnp.maximum(a1 * s1_ref[...] + b1_ref[...],
                         0.0).astype(jnp.bfloat16)                # stays in VMEM
        # 4) conv2, same structure.
        a2 = jnp.dot(w2t_ref[...], im2col(y1),
                     preferred_element_type=jnp.float32)          # (Cout, P)
        y2 = jnp.maximum(a2 * s2_ref[...] + b2_ref[...], 0.0)
        # 5) lane-dense store: last dim P = H*W (multiple of 128).
        o_ref[0] = y2.astype(o_ref.dtype)

    return kernel


# ---------------------------------------------------------------------------
# Parameters
# ---------------------------------------------------------------------------

def init_up_params(key, in_ch, out_ch):
    """Parameters of up(in_ch, out_ch, bilinear=True): double_conv(in_ch, out_ch)."""
    def conv_bn(k, cin, cout):
        k1, k2, k3, k4 = jax.random.split(k, 4)
        fan_in = cin * 9
        w = jax.random.normal(k1, (3, 3, cin, cout), jnp.float32) / np.sqrt(fan_in)
        b = 0.01 * jax.random.normal(k2, (cout,), jnp.float32)
        gamma = 1.0 + 0.1 * jax.random.normal(k3, (cout,), jnp.float32)
        beta = 0.1 * jax.random.normal(k4, (cout,), jnp.float32)
        # BatchNorm folded in inference mode: running_mean=0, running_var=1.
        scale = gamma / jnp.sqrt(1.0 + _BN_EPS)
        shift = beta + scale * b
        return w, scale, shift

    k1, k2 = jax.random.split(key)
    w1, s1, b1 = conv_bn(k1, in_ch, out_ch)
    w2, s2, b2 = conv_bn(k2, out_ch, out_ch)
    return {"w1": w1, "s1": s1, "b1": b1, "w2": w2, "s2": s2, "b2": b2}


def _prepare_kernel_params(params):
    """Flatten HWIO weights to (Cout, 9*Cin) bf16 (channels-major matmul LHS)."""
    w1, w2 = params["w1"], params["w2"]
    cin1, cmid = w1.shape[2], w1.shape[3]
    cout = w2.shape[3]
    return {
        "w1t": w1.reshape(9 * cin1, cmid).T.astype(jnp.bfloat16),   # (Cmid, 9*Cin1)
        "w2t": w2.reshape(9 * cmid, cout).T.astype(jnp.bfloat16),   # (Cout, 9*Cmid)
        "s1": params["s1"].reshape(cmid, 1),
        "b1": params["b1"].reshape(cmid, 1),
        "s2": params["s2"].reshape(cout, 1),
        "b2": params["b2"].reshape(cout, 1),
    }


# ---------------------------------------------------------------------------
# Forward
# ---------------------------------------------------------------------------

def up_forward(x1_nchw, x2_nchw, params):
    """Forward of `up`: upsample x1, replicate-pad to x2, concat, double_conv.

    NCHW in / NCHW out (f32). The kernel works channels-major, so NCHW maps
    straight onto the kernel layout with reshapes only (no transposes).
    """
    # TODO(synk): BatchNorm is reproduced in eval mode (running stats 0/1
    # folded into a per-channel affine); training-mode batch stats not computed.
    N, C1, h, w = x1_nchw.shape
    N2, C2, H, W = x2_nchw.shape
    assert N == N2
    P = H * W
    Cin1 = params["w1"].shape[2]
    Cmid = params["w1"].shape[3]
    Cout = params["w2"].shape[3]
    assert Cin1 == C1 + C2

    kp = _prepare_kernel_params(params)
    x1f = x1_nchw.reshape(N, C1, h * w).astype(jnp.bfloat16)
    x2f = x2_nchw.reshape(N, C2, P).astype(jnp.bfloat16)
    bup = jnp.asarray(_upsample_matrix(h, w, H, W), dtype=jnp.bfloat16)

    out = pl.pallas_call(
        _make_up_kernel(W, P),
        out_shape=jax.ShapeDtypeStruct((N, Cout, P), jnp.float32),
        grid=(N,),
        in_specs=[
            pl.BlockSpec((1, C1, h * w), lambda n: (n, 0, 0)),      # x1 (C, h*w)
            pl.BlockSpec((1, C2, P), lambda n: (n, 0, 0)),          # x2 (C, P)
            pl.BlockSpec((h * w, P), lambda n: (0, 0)),             # upsample mat
            pl.BlockSpec((Cmid, 9 * Cin1), lambda n: (0, 0)),       # conv1 weight
            pl.BlockSpec((Cmid, 1), lambda n: (0, 0)),              # BN1 scale
            pl.BlockSpec((Cmid, 1), lambda n: (0, 0)),              # BN1 shift
            pl.BlockSpec((Cout, 9 * Cmid), lambda n: (0, 0)),       # conv2 weight
            pl.BlockSpec((Cout, 1), lambda n: (0, 0)),              # BN2 scale
            pl.BlockSpec((Cout, 1), lambda n: (0, 0)),              # BN2 shift
        ],
        out_specs=pl.BlockSpec((1, Cout, P), lambda n: (n, 0, 0)),
        compiler_params=pltpu.CompilerParams(dimension_semantics=("parallel",)),
    )(x1f, x2f, bup, kp["w1t"], kp["s1"], kp["b1"], kp["w2t"], kp["s2"], kp["b2"])

    return out.reshape(N, Cout, H, W)   # channels-major (C, P) == NCHW already


def up_forward_reference(x1_nchw, x2_nchw, params):
    """Pure-JAX (f32) reference for numerical checking."""
    x1 = jnp.transpose(x1_nchw, (0, 2, 3, 1)).astype(jnp.float32)
    x2 = jnp.transpose(x2_nchw, (0, 2, 3, 1)).astype(jnp.float32)
    _, h, w, _ = x1.shape
    ah = jnp.asarray(_interp_matrix_1d(h, 2 * h))
    aw = jnp.asarray(_interp_matrix_1d(w, 2 * w))
    x1u = jnp.einsum("oi,nijc->nojc", ah, x1)
    x1u = jnp.einsum("pj,nojc->nopc", aw, x1u)
    dH = x2.shape[1] - x1u.shape[1]
    dW = x2.shape[2] - x1u.shape[2]
    if dH != 0 or dW != 0:
        x1u = jnp.pad(x1u, ((0, 0), (dH // 2, dH - dH // 2),
                            (dW // 2, dW - dW // 2), (0, 0)), mode="edge")
    x = jnp.concatenate([x2, x1u], axis=-1)

    def conv_bn_relu(z, w_, scale, shift):
        y = jax.lax.conv_general_dilated(
            z, w_, window_strides=(1, 1), padding="SAME",
            dimension_numbers=("NHWC", "HWIO", "NHWC"))
        return jnp.maximum(y * scale + shift, 0.0)

    y = conv_bn_relu(x, params["w1"], params["s1"], params["b1"])
    y = conv_bn_relu(y, params["w2"], params["s2"], params["b2"])
    return jnp.transpose(y, (0, 3, 1, 2))


if __name__ == "__main__":
    # up(in_ch=128, out_ch=64): x1 (deep features) 64ch @ 8x8,
    #                           x2 (skip features) 64ch @ 16x16, batch=2.
    key = jax.random.PRNGKey(0)
    k1, k2, kparams = jax.random.split(key, 3)
    x1 = jax.random.normal(k1, (2, 64, 8, 8), jnp.float32)     # NCHW
    x2 = jax.random.normal(k2, (2, 64, 16, 16), jnp.float32)   # NCHW
    params = init_up_params(kparams, in_ch=128, out_ch=64)

    y = jax.block_until_ready(jax.jit(up_forward)(x1, x2, params))
    assert y.shape == (2, 64, 16, 16), y.shape
    assert bool(jnp.all(jnp.isfinite(y)))

    y_ref = jax.block_until_ready(jax.jit(up_forward_reference)(x1, x2, params))
    max_abs_err = float(jnp.max(jnp.abs(y - y_ref)))
    assert max_abs_err < 0.25, f"max abs err vs reference = {max_abs_err}"

    print("KERNEL_OK")
</pallas_src>

<mosaic_0001>
module attributes {stable_mosaic.version = 11 : i64} {
  func.func @kernel(%arg0: i32, %arg1: memref<1x64x64xbf16, #tpu.memory_space<vmem>>, %arg2: memref<1x64x256xbf16, #tpu.memory_space<vmem>>, %arg3: memref<64x256xbf16, #tpu.memory_space<vmem>>, %arg4: memref<64x1152xbf16, #tpu.memory_space<vmem>>, %arg5: memref<64x1xf32, #tpu.memory_space<vmem>>, %arg6: memref<64x1xf32, #tpu.memory_space<vmem>>, %arg7: memref<64x576xbf16, #tpu.memory_space<vmem>>, %arg8: memref<64x1xf32, #tpu.memory_space<vmem>>, %arg9: memref<64x1xf32, #tpu.memory_space<vmem>>, %arg10: memref<1x64x256xf32, #tpu.memory_space<vmem>>) attributes {dimension_semantics = [#tpu.dimension_semantics<parallel>], iteration_bounds = array<i64: 2>, scalar_prefetch = 0 : i64, scratch_operands = 0 : i64, tpu.core_type = #tpu.core_type<tc>, window_params = [{transform_indices = @transform_0, window_bounds = array<i64: 1, 64, 64>}, {transform_indices = @transform_1, window_bounds = array<i64: 1, 64, 256>}, {pipeline_mode = #tpu.pipeline_mode<synchronous>, transform_indices = @transform_2, window_bounds = array<i64: 64, 256>}, {pipeline_mode = #tpu.pipeline_mode<synchronous>, transform_indices = @transform_3, window_bounds = array<i64: 64, 1152>}, {pipeline_mode = #tpu.pipeline_mode<synchronous>, transform_indices = @transform_4, window_bounds = array<i64: 64, 1>}, {pipeline_mode = #tpu.pipeline_mode<synchronous>, transform_indices = @transform_5, window_bounds = array<i64: 64, 1>}, {pipeline_mode = #tpu.pipeline_mode<synchronous>, transform_indices = @transform_6, window_bounds = array<i64: 64, 576>}, {pipeline_mode = #tpu.pipeline_mode<synchronous>, transform_indices = @transform_7, window_bounds = array<i64: 64, 1>}, {pipeline_mode = #tpu.pipeline_mode<synchronous>, transform_indices = @transform_8, window_bounds = array<i64: 64, 1>}, {transform_indices = @transform_9, window_bounds = array<i64: 1, 64, 256>}]} {
    %c0 = arith.constant 0 : index
    %c0_0 = arith.constant 0 : index
    %c0_1 = arith.constant 0 : index
    %0 = vector.load %arg1[%c0, %c0_0, %c0_1] : memref<1x64x64xbf16, #tpu.memory_space<vmem>>, vector<1x64x64xbf16>
    %1 = vector.shape_cast %0 : vector<1x64x64xbf16> to vector<64x64xbf16>
    %c0_2 = arith.constant 0 : index
    %c0_3 = arith.constant 0 : index
    %2 = vector.load %arg3[%c0_2, %c0_3] : memref<64x256xbf16, #tpu.memory_space<vmem>>, vector<64x256xbf16>
    %cst = arith.constant dense<0.000000e+00> : vector<64x256xf32>
    %3 = tpu.matmul %1, %2, %cst {dimension_numbers = #tpu.dot_dimension_numbers<[1], [0], [0], [1], [0, 0, 1, 1], [], []>} : vector<64x64xbf16>, vector<64x256xbf16>, vector<64x256xf32> -> vector<64x256xf32>
    %4 = arith.truncf %3 : vector<64x256xf32> to vector<64x256xbf16>
    %c0_4 = arith.constant 0 : index
    %c0_5 = arith.constant 0 : index
    %c0_6 = arith.constant 0 : index
    %5 = vector.load %arg2[%c0_4, %c0_5, %c0_6] : memref<1x64x256xbf16, #tpu.memory_space<vmem>>, vector<1x64x256xbf16>
    %6 = vector.shape_cast %5 : vector<1x64x256xbf16> to vector<64x256xbf16>
    %7 = tpu.concatenate %6, %4 in 0 : vector<64x256xbf16>, vector<64x256xbf16> -> vector<128x256xbf16>
    %c0_7 = arith.constant 0 : index
    %c0_8 = arith.constant 0 : index
    %8 = vector.load %arg4[%c0_7, %c0_8] : memref<64x1152xbf16, #tpu.memory_space<vmem>>, vector<64x1152xbf16>
    %9 = tpu.iota {dimensions = array<i32: 1>} : vector<1x256xi32>
    %c16_i32 = arith.constant 16 : i32
    %c0_i32 = arith.constant 0 : i32
    %10 = arith.cmpi eq, %c16_i32, %c0_i32 : i32
    %c1_i32 = arith.constant 1 : i32
    %11 = arith.select %10, %c1_i32, %c16_i32 : i32
    %12 = vector.broadcast %11 : i32 to vector<1x256xi32>
    %13 = arith.remsi %9, %12 : vector<1x256xi32>
    %c0_i32_9 = arith.constant 0 : i32
    %14 = vector.broadcast %c0_i32_9 : i32 to vector<1x256xi32>
    %15 = arith.cmpi ne, %13, %14 : vector<1x256xi32>
    %c0_i32_10 = arith.constant 0 : i32
    %16 = vector.broadcast %c0_i32_10 : i32 to vector<1x256xi32>
    %17 = arith.cmpi slt, %13, %16 : vector<1x256xi32>
    %c0_i32_11 = arith.constant 0 : i32
    %18 = arith.cmpi slt, %11, %c0_i32_11 : i32
    %19 = vector.broadcast %18 : i1 to vector<1x256xi1>
    %20 = vector.broadcast %19 : vector<1x256xi1> to vector<1x256xi1>
    %21 = arith.xori %17, %20 : vector<1x256xi1>
    %22 = arith.andi %21, %15 : vector<1x256xi1>
    %23 = vector.broadcast %11 : i32 to vector<1x256xi32>
    %24 = arith.addi %13, %23 : vector<1x256xi32>
    %25 = arith.select %22, %24, %13 : vector<1x256xi1>, vector<1x256xi32>
    %c0_i32_12 = arith.constant 0 : i32
    %26 = vector.broadcast %c0_i32_12 : i32 to vector<1x256xi32>
    %27 = arith.cmpi ne, %25, %26 : vector<1x256xi32>
    %cst_13 = arith.constant 0.000000e+00 : bf16
    %28 = vector.broadcast %cst_13 : bf16 to vector<128x256xbf16>
    %29 = vector.shape_cast %27 : vector<1x256xi1> to vector<1x256xi1>
    %30 = vector.broadcast %29 : vector<1x256xi1> to vector<128x256xi1>
    %31 = arith.select %30, %7, %28 : vector<128x256xi1>, vector<128x256xbf16>
    %c15_i32 = arith.constant 15 : i32
    %32 = vector.broadcast %c15_i32 : i32 to vector<1x256xi32>
    %33 = arith.cmpi ne, %25, %32 : vector<1x256xi32>
    %cst_14 = arith.constant 0.000000e+00 : bf16
    %34 = vector.broadcast %cst_14 : bf16 to vector<128x256xbf16>
    %35 = vector.shape_cast %33 : vector<1x256xi1> to vector<1x256xi1>
    %36 = vector.broadcast %35 : vector<1x256xi1> to vector<128x256xi1>
    %37 = arith.select %36, %7, %34 : vector<128x256xi1>, vector<128x256xbf16>
    %cst_15 = arith.constant 0.000000e+00 : bf16
    %38 = vector.broadcast %cst_15 : bf16 to vector<128x17xbf16>
    %39 = vector.extract_strided_slice %37 {offsets = [0, 0], sizes = [128, 239], strides = [1, 1]} : vector<128x256xbf16> to vector<128x239xbf16>
    %40 = tpu.concatenate %38, %39 in 1 : vector<128x17xbf16>, vector<128x239xbf16> -> vector<128x256xbf16>
    %cst_16 = arith.constant 0.000000e+00 : bf16
    %41 = vector.broadcast %cst_16 : bf16 to vector<128x16xbf16>
    %42 = vector.extract_strided_slice %7 {offsets = [0, 0], sizes = [128, 240], strides = [1, 1]} : vector<128x256xbf16> to vector<128x240xbf16>
    %43 = tpu.concatenate %41, %42 in 1 : vector<128x16xbf16>, vector<128x240xbf16> -> vector<128x256xbf16>
    %cst_17 = arith.constant 0.000000e+00 : bf16
    %44 = vector.broadcast %cst_17 : bf16 to vector<128x15xbf16>
    %45 = vector.extract_strided_slice %31 {offsets = [0, 0], sizes = [128, 241], strides = [1, 1]} : vector<128x256xbf16> to vector<128x241xbf16>
    %46 = tpu.concatenate %44, %45 in 1 : vector<128x15xbf16>, vector<128x241xbf16> -> vector<128x256xbf16>
    %cst_18 = arith.constant 0.000000e+00 : bf16
    %47 = vector.broadcast %cst_18 : bf16 to vector<128x1xbf16>
    %48 = vector.extract_strided_slice %37 {offsets = [0, 0], sizes = [128, 255], strides = [1, 1]} : vector<128x256xbf16> to vector<128x255xbf16>
    %49 = tpu.concatenate %47, %48 in 1 : vector<128x1xbf16>, vector<128x255xbf16> -> vector<128x256xbf16>
    %cst_19 = arith.constant 0.000000e+00 : bf16
    %50 = vector.broadcast %cst_19 : bf16 to vector<128x1xbf16>
    %51 = vector.extract_strided_slice %31 {offsets = [0, 1], sizes = [128, 255], strides = [1, 1]} : vector<128x256xbf16> to vector<128x255xbf16>
    %52 = tpu.concatenate %51, %50 in 1 : vector<128x255xbf16>, vector<128x1xbf16> -> vector<128x256xbf16>
    %cst_20 = arith.constant 0.000000e+00 : bf16
    %53 = vector.broadcast %cst_20 : bf16 to vector<128x15xbf16>
    %54 = vector.extract_strided_slice %37 {offsets = [0, 15], sizes = [128, 241], strides = [1, 1]} : vector<128x256xbf16> to vector<128x241xbf16>
    %55 = tpu.concatenate %54, %53 in 1 : vector<128x241xbf16>, vector<128x15xbf16> -> vector<128x256xbf16>
    %cst_21 = arith.constant 0.000000e+00 : bf16
    %56 = vector.broadcast %cst_21 : bf16 to vector<128x16xbf16>
    %57 = vector.extract_strided_slice %7 {offsets = [0, 16], sizes = [128, 240], strides = [1, 1]} : vector<128x256xbf16> to vector<128x240xbf16>
    %58 = tpu.concatenate %57, %56 in 1 : vector<128x240xbf16>, vector<128x16xbf16> -> vector<128x256xbf16>
    %cst_22 = arith.constant 0.000000e+00 : bf16
    %59 = vector.broadcast %cst_22 : bf16 to vector<128x17xbf16>
    %60 = vector.extract_strided_slice %31 {offsets = [0, 17], sizes = [128, 239], strides = [1, 1]} : vector<128x256xbf16> to vector<128x239xbf16>
    %61 = tpu.concatenate %60, %59 in 1 : vector<128x239xbf16>, vector<128x17xbf16> -> vector<128x256xbf16>
    %62 = tpu.concatenate %40, %43, %46, %49, %7, %52, %55, %58, %61 in 0 : vector<128x256xbf16>, vector<128x256xbf16>, vector<128x256xbf16>, vector<128x256xbf16>, vector<128x256xbf16>, vector<128x256xbf16>, vector<128x256xbf16>, vector<128x256xbf16>, vector<128x256xbf16> -> vector<1152x256xbf16>
    %cst_23 = arith.constant dense<0.000000e+00> : vector<64x256xf32>
    %63 = tpu.matmul %8, %62, %cst_23 {dimension_numbers = #tpu.dot_dimension_numbers<[1], [0], [0], [1], [0, 0, 1, 1], [], []>} : vector<64x1152xbf16>, vector<1152x256xbf16>, vector<64x256xf32> -> vector<64x256xf32>
    %c0_24 = arith.constant 0 : index
    %c0_25 = arith.constant 0 : index
    %64 = vector.load %arg5[%c0_24, %c0_25] : memref<64x1xf32, #tpu.memory_space<vmem>>, vector<64x1xf32>
    %65 = vector.broadcast %64 : vector<64x1xf32> to vector<64x256xf32>
    %66 = arith.mulf %63, %65 : vector<64x256xf32>
    %c0_26 = arith.constant 0 : index
    %c0_27 = arith.constant 0 : index
    %67 = vector.load %arg6[%c0_26, %c0_27] : memref<64x1xf32, #tpu.memory_space<vmem>>, vector<64x1xf32>
    %68 = vector.broadcast %67 : vector<64x1xf32> to vector<64x256xf32>
    %69 = arith.addf %66, %68 : vector<64x256xf32>
    %cst_28 = arith.constant 0.000000e+00 : f32
    %70 = vector.broadcast %cst_28 : f32 to vector<64x256xf32>
    %71 = arith.maximumf %69, %70 : vector<64x256xf32>
    %72 = arith.truncf %71 : vector<64x256xf32> to vector<64x256xbf16>
    %c0_29 = arith.constant 0 : index
    %c0_30 = arith.constant 0 : index
    %73 = vector.load %arg7[%c0_29, %c0_30] : memref<64x576xbf16, #tpu.memory_space<vmem>>, vector<64x576xbf16>
    %74 = tpu.iota {dimensions = array<i32: 1>} : vector<1x256xi32>
    %c16_i32_31 = arith.constant 16 : i32
    %c0_i32_32 = arith.constant 0 : i32
    %75 = arith.cmpi eq, %c16_i32_31, %c0_i32_32 : i32
    %c1_i32_33 = arith.constant 1 : i32
    %76 = arith.select %75, %c1_i32_33, %c16_i32_31 : i32
    %77 = vector.broadcast %76 : i32 to vector<1x256xi32>
    %78 = arith.remsi %74, %77 : vector<1x256xi32>
    %c0_i32_34 = arith.constant 0 : i32
    %79 = vector.broadcast %c0_i32_34 : i32 to vector<1x256xi32>
    %80 = arith.cmpi ne, %78, %79 : vector<1x256xi32>
    %c0_i32_35 = arith.constant 0 : i32
    %81 = vector.broadcast %c0_i32_35 : i32 to vector<1x256xi32>
    %82 = arith.cmpi slt, %78, %81 : vector<1x256xi32>
    %c0_i32_36 = arith.constant 0 : i32
    %83 = arith.cmpi slt, %76, %c0_i32_36 : i32
    %84 = vector.broadcast %83 : i1 to vector<1x256xi1>
    %85 = vector.broadcast %84 : vector<1x256xi1> to vector<1x256xi1>
    %86 = arith.xori %82, %85 : vector<1x256xi1>
    %87 = arith.andi %86, %80 : vector<1x256xi1>
    %88 = vector.broadcast %76 : i32 to vector<1x256xi32>
    %89 = arith.addi %78, %88 : vector<1x256xi32>
    %90 = arith.select %87, %89, %78 : vector<1x256xi1>, vector<1x256xi32>
    %c0_i32_37 = arith.constant 0 : i32
    %91 = vector.broadcast %c0_i32_37 : i32 to vector<1x256xi32>
    %92 = arith.cmpi ne, %90, %91 : vector<1x256xi32>
    %cst_38 = arith.constant 0.000000e+00 : bf16
    %93 = vector.broadcast %cst_38 : bf16 to vector<64x256xbf16>
    %94 = vector.shape_cast %92 : vector<1x256xi1> to vector<1x256xi1>
    %95 = vector.broadcast %94 : vector<1x256xi1> to vector<64x256xi1>
    %96 = arith.select %95, %72, %93 : vector<64x256xi1>, vector<64x256xbf16>
    %c15_i32_39 = arith.constant 15 : i32
    %97 = vector.broadcast %c15_i32_39 : i32 to vector<1x256xi32>
    %98 = arith.cmpi ne, %90, %97 : vector<1x256xi32>
    %cst_40 = arith.constant 0.000000e+00 : bf16
    %99 = vector.broadcast %cst_40 : bf16 to vector<64x256xbf16>
    %100 = vector.shape_cast %98 : vector<1x256xi1> to vector<1x256xi1>
    %101 = vector.broadcast %100 : vector<1x256xi1> to vector<64x256xi1>
    %102 = arith.select %101, %72, %99 : vector<64x256xi1>, vector<64x256xbf16>
    %cst_41 = arith.constant 0.000000e+00 : bf16
    %103 = vector.broadcast %cst_41 : bf16 to vector<64x17xbf16>
    %104 = vector.extract_strided_slice %102 {offsets = [0, 0], sizes = [64, 239], strides = [1, 1]} : vector<64x256xbf16> to vector<64x239xbf16>
    %105 = tpu.concatenate %103, %104 in 1 : vector<64x17xbf16>, vector<64x239xbf16> -> vector<64x256xbf16>
    %cst_42 = arith.constant 0.000000e+00 : bf16
    %106 = vector.broadcast %cst_42 : bf16 to vector<64x16xbf16>
    %107 = vector.extract_strided_slice %72 {offsets = [0, 0], sizes = [64, 240], strides = [1, 1]} : vector<64x256xbf16> to vector<64x240xbf16>
    %108 = tpu.concatenate %106, %107 in 1 : vector<64x16xbf16>, vector<64x240xbf16> -> vector<64x256xbf16>
    %cst_43 = arith.constant 0.000000e+00 : bf16
    %109 = vector.broadcast %cst_43 : bf16 to vector<64x15xbf16>
    %110 = vector.extract_strided_slice %96 {offsets = [0, 0], sizes = [64, 241], strides = [1, 1]} : vector<64x256xbf16> to vector<64x241xbf16>
    %111 = tpu.concatenate %109, %110 in 1 : vector<64x15xbf16>, vector<64x241xbf16> -> vector<64x256xbf16>
    %cst_44 = arith.constant 0.000000e+00 : bf16
    %112 = vector.broadcast %cst_44 : bf16 to vector<64x1xbf16>
    %113 = vector.extract_strided_slice %102 {offsets = [0, 0], sizes = [64, 255], strides = [1, 1]} : vector<64x256xbf16> to vector<64x255xbf16>
    %114 = tpu.concatenate %112, %113 in 1 : vector<64x1xbf16>, vector<64x255xbf16> -> vector<64x256xbf16>
    %cst_45 = arith.constant 0.000000e+00 : bf16
    %115 = vector.broadcast %cst_45 : bf16 to vector<64x1xbf16>
    %116 = vector.extract_strided_slice %96 {offsets = [0, 1], sizes = [64, 255], strides = [1, 1]} : vector<64x256xbf16> to vector<64x255xbf16>
    %117 = tpu.concatenate %116, %115 in 1 : vector<64x255xbf16>, vector<64x1xbf16> -> vector<64x256xbf16>
    %cst_46 = arith.constant 0.000000e+00 : bf16
    %118 = vector.broadcast %cst_46 : bf16 to vector<64x15xbf16>
    %119 = vector.extract_strided_slice %102 {offsets = [0, 15], sizes = [64, 241], strides = [1, 1]} : vector<64x256xbf16> to vector<64x241xbf16>
    %120 = tpu.concatenate %119, %118 in 1 : vector<64x241xbf16>, vector<64x15xbf16> -> vector<64x256xbf16>
    %cst_47 = arith.constant 0.000000e+00 : bf16
    %121 = vector.broadcast %cst_47 : bf16 to vector<64x16xbf16>
    %122 = vector.extract_strided_slice %72 {offsets = [0, 16], sizes = [64, 240], strides = [1, 1]} : vector<64x256xbf16> to vector<64x240xbf16>
    %123 = tpu.concatenate %122, %121 in 1 : vector<64x240xbf16>, vector<64x16xbf16> -> vector<64x256xbf16>
    %cst_48 = arith.constant 0.000000e+00 : bf16
    %124 = vector.broadcast %cst_48 : bf16 to vector<64x17xbf16>
    %125 = vector.extract_strided_slice %96 {offsets = [0, 17], sizes = [64, 239], strides = [1, 1]} : vector<64x256xbf16> to vector<64x239xbf16>
    %126 = tpu.concatenate %125, %124 in 1 : vector<64x239xbf16>, vector<64x17xbf16> -> vector<64x256xbf16>
    %127 = tpu.concatenate %105, %108, %111, %114, %72, %117, %120, %123, %126 in 0 : vector<64x256xbf16>, vector<64x256xbf16>, vector<64x256xbf16>, vector<64x256xbf16>, vector<64x256xbf16>, vector<64x256xbf16>, vector<64x256xbf16>, vector<64x256xbf16>, vector<64x256xbf16> -> vector<576x256xbf16>
    %cst_49 = arith.constant dense<0.000000e+00> : vector<64x256xf32>
    %128 = tpu.matmul %73, %127, %cst_49 {dimension_numbers = #tpu.dot_dimension_numbers<[1], [0], [0], [1], [0, 0, 1, 1], [], []>} : vector<64x576xbf16>, vector<576x256xbf16>, vector<64x256xf32> -> vector<64x256xf32>
    %c0_50 = arith.constant 0 : index
    %c0_51 = arith.constant 0 : index
    %129 = vector.load %arg8[%c0_50, %c0_51] : memref<64x1xf32, #tpu.memory_space<vmem>>, vector<64x1xf32>
    %130 = vector.broadcast %129 : vector<64x1xf32> to vector<64x256xf32>
    %131 = arith.mulf %128, %130 : vector<64x256xf32>
    %c0_52 = arith.constant 0 : index
    %c0_53 = arith.constant 0 : index
    %132 = vector.load %arg9[%c0_52, %c0_53] : memref<64x1xf32, #tpu.memory_space<vmem>>, vector<64x1xf32>
    %133 = vector.broadcast %132 : vector<64x1xf32> to vector<64x256xf32>
    %134 = arith.addf %131, %133 : vector<64x256xf32>
    %cst_54 = arith.constant 0.000000e+00 : f32
    %135 = vector.broadcast %cst_54 : f32 to vector<64x256xf32>
    %136 = arith.maximumf %134, %135 : vector<64x256xf32>
    %c0_55 = arith.constant 0 : index
    %c0_56 = arith.constant 0 : index
    %c0_57 = arith.constant 0 : index
    %137 = vector.load %arg10[%c0_55, %c0_56, %c0_57] : memref<1x64x256xf32, #tpu.memory_space<vmem>>, vector<1x64x256xf32>
    %138 = vector.shape_cast %137 : vector<1x64x256xf32> to vector<64x256xf32>
    %139 = vector.shape_cast %136 : vector<64x256xf32> to vector<1x64x256xf32>
    tpu.vector_store %arg10[%c0_55, %c0_56, %c0_57], %139 {strides = array<i32>} : memref<1x64x256xf32, #tpu.memory_space<vmem>>, vector<1x64x256xf32>,
    return
  }
  func.func @transform_0(%arg0: i32) -> (i32, i32, i32) {
    %c0_i32 = arith.constant 0 : i32
    %c0_i32_0 = arith.constant 0 : i32
    %c0_i32_1 = arith.constant 0 : i32
    return %arg0, %c0_i32, %c0_i32_0 : i32, i32, i32
  }
  func.func @transform_1(%arg0: i32) -> (i32, i32, i32) {
    %c0_i32 = arith.constant 0 : i32
    %c0_i32_0 = arith.constant 0 : i32
    %c0_i32_1 = arith.constant 0 : i32
    return %arg0, %c0_i32, %c0_i32_0 : i32, i32, i32
  }
  func.func @transform_2(%arg0: i32) -> (i32, i32) {
    %c0_i32 = arith.constant 0 : i32
    %c0_i32_0 = arith.constant 0 : i32
    %c0_i32_1 = arith.constant 0 : i32
    return %c0_i32, %c0_i32_0 : i32, i32
  }
  func.func @transform_3(%arg0: i32) -> (i32, i32) {
    %c0_i32 = arith.constant 0 : i32
    %c0_i32_0 = arith.constant 0 : i32
    %c0_i32_1 = arith.constant 0 : i32
    return %c0_i32, %c0_i32_0 : i32, i32
  }
  func.func @transform_4(%arg0: i32) -> (i32, i32) {
    %c0_i32 = arith.constant 0 : i32
    %c0_i32_0 = arith.constant 0 : i32
    %c0_i32_1 = arith.constant 0 : i32
    return %c0_i32, %c0_i32_0 : i32, i32
  }
  func.func @transform_5(%arg0: i32) -> (i32, i32) {
    %c0_i32 = arith.constant 0 : i32
    %c0_i32_0 = arith.constant 0 : i32
    %c0_i32_1 = arith.constant 0 : i32
    return %c0_i32, %c0_i32_0 : i32, i32
  }
  func.func @transform_6(%arg0: i32) -> (i32, i32) {
    %c0_i32 = arith.constant 0 : i32
    %c0_i32_0 = arith.constant 0 : i32
    %c0_i32_1 = arith.constant 0 : i32
    return %c0_i32, %c0_i32_0 : i32, i32
  }
  func.func @transform_7(%arg0: i32) -> (i32, i32) {
    %c0_i32 = arith.constant 0 : i32
    %c0_i32_0 = arith.constant 0 : i32
    %c0_i32_1 = arith.constant 0 : i32
    return %c0_i32, %c0_i32_0 : i32, i32
  }
  func.func @transform_8(%arg0: i32) -> (i32, i32) {
    %c0_i32 = arith.constant 0 : i32
    %c0_i32_0 = arith.constant 0 : i32
    %c0_i32_1 = arith.constant 0 : i32
    return %c0_i32, %c0_i32_0 : i32, i32
  }
  func.func @transform_9(%arg0: i32) -> (i32, i32, i32) {
    %c0_i32 = arith.constant 0 : i32
    %c0_i32_0 = arith.constant 0 : i32
    %c0_i32_1 = arith.constant 0 : i32
    return %arg0, %c0_i32, %c0_i32_0 : i32, i32, i32
  }
}

</mosaic_0001>

<bundles_post_ra>
// kernel: up_forward.1
= control target key start
LH: loop header
LB: loop body
LE: loop exit
PB: predicated region body
PF: predicated region fallthrough
CT: control target
= control target key end

     0   :  { %s3495_s30 = smov 0   ;;  %s5020_s0 = inlined_call_operand.vmem [shape: bf16[2,64,64], index: 0, kind: input, shape index: {}]   ;;  %s5021_s1 = inlined_call_operand.vmem [shape: bf16[2,64,256], index: 1, kind: input, shape index: {}]   ;;  %s5022_s2 = inlined_call_operand.vmem [shape: bf16[64,256], index: 2, kind: input, shape index: {}]   ;;  %s5023_s3 = inlined_call_operand.vmem [shape: bf16[64,1152], index: 3, kind: input, shape index: {}]   ;;  %s5024_s4 = inlined_call_operand.vmem [shape: f32[64,1], index: 4, kind: input, shape index: {}]   ;;  %s5025_s5 = inlined_call_operand.vmem [shape: f32[64,1], index: 5, kind: input, shape index: {}]   ;;  %s5026_s6 = inlined_call_operand.vmem [shape: bf16[64,576], index: 6, kind: input, shape index: {}]   ;;  %s5027_s7 = inlined_call_operand.vmem [shape: f32[64,1], index: 7, kind: input, shape index: {}]   ;;  %s5028_s8 = inlined_call_operand.vmem [shape: f32[64,1], index: 8, kind: input, shape index: {}]   ;;  %s5029_s9 = inlined_call_operand.vmem [shape: f32[2,64,256], index: 9, kind: output, shape index: {}]  }
   0x1 LB: > { %s2953_s10 = sadd.s32 4294967295, %s3434_s30   ;;  %p2957_p0 = scmp.ge.s32.totalorder %s3434_s30, 1  ;;  %s3434_s30 = sphi %s3495_s30, %s19_s30  }
   0x2   : > { %p297_p1 = scmp.lt.s32.totalorder %s3434_s30, 3 }
   0x4   : > { %p298_p2 = pnand %p2957_p0, %p297_p1 }
   0x5   : > { %v3320_v0 = vld [vmem:[%s5022_s2 + $0x4] ss:$8 sps:$4 sm:$0xff] (!%p298_p2)   ;;  %p338_p3 = scmp.lt.s32.totalorder (!%p298_p2), %s2953_s10, 1  ;;  %v614_v1 = vlaneseq (!%p298_p2)  ;;  %v3322_v2 = vld [vmem:[%s5022_s2] ss:$8 sps:$4 sm:$0xff] (!%p298_p2)   ;;  %v3436_v3 = vmov (!%p298_p2), 0  }
   0x6   : > { %301 = sbr.rel (%p298_p2) target bundleno = 1332 (0x534), region = 56  ;;  %477 = vmatprep.mubr.bf16.mxu0 (!%p298_p2), %v3436_v3  ;;  %3319 = vset.pattern.permute.xlu1 (!%p298_p2), %v3436_v3  ;;  %v3323_v4 = vld [vmem:[%s5022_s2 + $0x14] ss:$8 sps:$4 sm:$0xff] (!%p298_p2)   ;;  %v3325_v5 = vld [vmem:[%s5022_s2 + $0x10] ss:$8 sps:$4 sm:$0xff] (!%p298_p2)   ;;  %vm5030_vm5 = vcmask (!%p298_p2), 523264  }
   0x7   : > { %445 = vmatprep.subr.bf16.mxu0 (!%p298_p2), %v3320_v0  ;;  %3318 = vset.pattern.permute.xlu0 (!%p298_p2), %v3436_v3  ;;  %v615_v6 = vand.u32 (!%p298_p2), 127, %v614_v1  ;;  %v3326_v7 = vld [vmem:[%s5022_s2 + $0x24] ss:$8 sps:$4 sm:$0xff] (!%p298_p2)   ;;  %v3328_v8 = vld [vmem:[%s5022_s2 + $0x20] ss:$8 sps:$4 sm:$0xff] (!%p298_p2)   ;;  %v650_v12 = vshrl.u32 (!%p298_p2), %v614_v1, 7 }
   0x8   : > { %446 = vmatpush1.bf16.msra.mxu0 (!%p298_p2), %v3322_v2  ;;  %v3329_v11 = vld [vmem:[%s5022_s2 + $0x34] ss:$8 sps:$4 sm:$0xff] (!%p298_p2)   ;;  %v3331_v14 = vld [vmem:[%s5022_s2 + $0x30] ss:$8 sps:$4 sm:$0xff] (!%p298_p2)   ;;  %s3437_s16 = smov (!%p298_p2), 15   ;;  %s3438_s17 = smov (!%p298_p2), 1  }
   0x9   : > { %447 = vmatprep.subr.bf16.mxu0 (!%p298_p2), %v3323_v4  ;;  %v616_v9 = vadd.s32 (!%p298_p2), 128, %v615_v6  ;;  %v621_v10 = vand.u32 (!%p298_p2), 15, %v615_v6  ;;  %v651_v15 = vsub.s32 (!%p298_p2), 0, %v650_v12  ;;  %v655_v16 = vsub.s32 (!%p298_p2), 4, %v650_v12  ;;  %s3439_s18 = smov (!%p298_p2), 127   ;;  %s3441_s22 = smov (!%p298_p2), 17  }
   0xa   : > { %vm930_vm11 = vcmask (!%p298_p2), 121856   ;;  %s3442_s23 = smov (!%p298_p2), 112   ;;  %vm1004_vm13 = vcmask (!%p298_p2), 7168   ;;  %s3443_s24 = smov (!%p298_p2), 16   ;;  %vm1078_vm15 = vcmask (!%p298_p2), 1039360  }
   0xb   : > { %v628_v13 = vand.u32 (!%p298_p2), 15, %v616_v9  ;;  %vm641_vm0 = vcmp.ne.s32.totalorder (!%p298_p2), %v621_v10, 0  ;;  %vm3559_vm3 = vcmp.ne.s32.totalorder (!%p298_p2), %v621_v10, 15  ;;  %vm3719_vm12 = vmneg (!%p298_p2), %vm930_vm11  ;;  %s3444_s25 = smov (!%p298_p2), 111  }
   0xc   : > { %448 = vmatpush1.bf16.msra.mxu0 (!%p298_p2), %v3325_v5  ;;  %vm4021_vm14 = vmneg (!%p298_p2), %vm1004_vm13 }
   0xd   : > { %s5048_s10 = smov (!%p338_p3, %s2953_s10), 1  ;;  %449 = vmatprep.subr.bf16.mxu0 %v3326_v7  ;;  %vm642_vm1 = vcmp.ne.s32.totalorder %v628_v13, 0  ;;  %vm3563_vm4 = vcmp.ne.s32.totalorder %v628_v13, 15 }
   0xe   : > { %s3194_s21 = sshll.u32 %s5048_s10, 5  ;;  %s3195_s29 = sshll.u32 %s5048_s10, 6  ;;  %vm647_vm2 = vmpackc.low %vm642_vm1, %vm641_vm0  ;;  %vm757_vm0 = vcmask 138240  }
   0xf   : > { %s3530_s26 = scalar_lea.vmem %s5020_s0, %s3194_s21  ;;  %s3539_s13 = scalar_lea.vmem %s5021_s1, %s3195_s29  ;;  %v648_v18 = vsel %vm647_vm2, 65537, %v3436_v3  ;;  %vm681_vm8 = vmpackc.low %vm3563_vm4, %vm3559_vm3  ;;  %vm1152_vm2 = vcmask 924672   ;;  %vm1226_vm3 = vcmask 916480   ;;  %vm840_vm4 = vcmask 130048  }
  0x10   : > { %450 = vmatpush1.bf16.msra.mxu0 %v3328_v8  ;;  %v3545_v17 = vld [vmem:[%s3539_s13] ss:$8 sps:$4 sm:$0xff]   ;;  %v3549_v19 = vld [vmem:[%s3539_s13 + $0x10] ss:$8 sps:$4 sm:$0xff]   ;;  %v3552_v21 = vrot.slane %v648_v18, %v651_v15  ;;  %v3555_v22 = vld [vmem:[%s3539_s13 + $0x4] ss:$8 sps:$4 sm:$0xff]   ;;  %v3557_v23 = vrot.slane %v648_v18, %v655_v16 }
  0x11   : > { %451 = vmatprep.subr.bf16.mxu0 %v3329_v11  ;;  %v3332_v20 = vld [vmem:[%s3530_s26] sm:$0xff]   ;;  %v3568_v26 = vld [vmem:[%s3539_s13 + $0x14] ss:$8 sps:$4 sm:$0xff]   ;;  %v3612_v34 = vld [vmem:[%s3539_s13 + $0x30] ss:$8 sps:$4 sm:$0xff]   ;;  %v682_v35 = vsel %vm681_vm8, 65537, %v3436_v3 }
  0x12   : > { %vm657_vm6 = vcmp.ne.s16.totalorder %v3552_v21, 0  ;;  %vm658_vm7 = vcmp.ne.s16.totalorder %v3557_v23, 0  ;;  %v3583_v29 = vld [vmem:[%s3539_s13 + $0x24] ss:$8 sps:$4 sm:$0xff]   ;;  %v3586_v30 = vld [vmem:[%s3539_s13 + $0x20] ss:$8 sps:$4 sm:$0xff]   ;;  %v3630_v39 = vrot.slane %v682_v35, %v651_v15  ;;  %v3632_v40 = vrot.slane %v682_v35, %v655_v16  ;;  %vm4240_vm1 = vmneg %vm757_vm0 }
  0x13   : > { %v3575_v27 = vsel %vm657_vm6, %v3545_v17, 0  ;;  %v3580_v28 = vsel %vm657_vm6, %v3549_v19, 0  ;;  %v3600_v31 = vsel %vm658_vm7, %v3555_v22, 0  ;;  %v3605_v32 = vsel %vm658_vm7, %v3568_v26, 0  ;;  %v3609_v33 = vld [vmem:[%s3539_s13 + $0x34] ss:$8 sps:$4 sm:$0xff]   ;;  %vm4487_vm8 = vmneg %vm840_vm4 }
  0x14   : > { %452 = vmatpush1.bf16.msra.mxu0 %v3331_v14  ;;  %898 = vrot.lane.b32.xlu0 %v3575_v27, %s3437_s16  ;;  %v3333_v36 = vld [vmem:[%s3530_s26 + $0x8] sm:$0xff]   ;;  %v3623_v37 = vsel %vm658_vm7, %v3583_v29, 0  ;;  %v3628_v38 = vsel %vm657_vm6, %v3586_v30, 0  ;;  %v3641_v41 = vsel %vm658_vm7, %v3609_v33, 0  ;;  %v3646_v42 = vsel %vm657_vm6, %v3612_v34, 0  ;;  %v3334_v43 = vld [vmem:[%s3530_s26 + $0x10] sm:$0xff]  }
  0x15   : > { %902 = vrot.lane.b32.xlu1 %v3580_v28, %s3437_s16  ;;  %vm691_vm9 = vcmp.ne.s16.totalorder %v3630_v39, 0  ;;  %vm692_vm10 = vcmp.ne.s16.totalorder %v3632_v40, 0  ;;  %v3335_v48 = vld [vmem:[%s3530_s26 + $0x18] sm:$0xff]   ;;  %s3440_s21 = smov 113   ;;  %s3196_s20 = sshll.u32 %s5048_s10, 7 }
  0x16   : > { %v3660_v44 = vsel %vm691_vm9, %v3545_v17, 0  ;;  %v3665_v45 = vsel %vm692_vm10, %v3555_v22, 0  ;;  %v3675_v46 = vsel %vm691_vm9, %v3549_v19, 0  ;;  %v3680_v47 = vsel %vm692_vm10, %v3568_v26, 0  ;;  %s4985_s28 = scalar_lea.vmem %s5029_s9, %s3196_s20 }
  0x17   : > { %2976 = vmatmul.mubr.msk.bf16.vlgmr.msra.gmra.mrb[0].mxu0 %vm5030_vm5, %v3332_v20  ;;  %v3691_v49 = vsel %vm691_vm9, %v3586_v30, 0  ;;  %v3696_v50 = vsel %vm692_vm10, %v3583_v29, 0  ;;  %v3706_v51 = vsel %vm691_vm9, %v3612_v34, 0  ;;  %v3713_v52 = vsel %vm692_vm10, %v3609_v33, 0 }
  0x18   : > { %487 = vmatprep.mubr.bf16.mxu0 %v3436_v3  ;;  %900 = vrot.lane.b32.xlu0 %v3600_v31, %s3437_s16 }
  0x19   : > { %904 = vrot.lane.b32.xlu1 %v3605_v32, %s3437_s16 }
  0x1c   : > { %906 = vrot.lane.b32.xlu0 %v3628_v38, %s3437_s16 }
  0x1d   : > { %908 = vrot.lane.b32.xlu1 %v3623_v37, %s3437_s16 }
  0x1f   : > { %2977 = vmatmul.mubr.msk.bf16.gmra.mrb[4].mxu0 %vm5030_vm5, %v3333_v36 }
  0x20   : > { %497 = vmatprep.mubr.bf16.mxu0 %v3436_v3  ;;  %910 = vrot.lane.b32.xlu0 %v3646_v42, %s3437_s16 }
  0x21   : > { %912 = vrot.lane.b32.xlu1 %v3641_v41, %s3437_s16 }
  0x24   : > { %972 = vrot.lane.b32.xlu0 %v3660_v44, %s3438_s17 }
  0x25   : > { %974 = vrot.lane.b32.xlu1 %v3665_v45, %s3438_s17 }
  0x27   : > { %2978 = vmatmul.mubr.msk.bf16.gmra.mrb[8].mxu0 %vm5030_vm5, %v3334_v43 }
  0x28   : > { %507 = vmatprep.mubr.bf16.mxu0 %v3436_v3  ;;  %976 = vrot.lane.b32.xlu0 %v3675_v46, %s3438_s17 }
  0x29   : > { %978 = vrot.lane.b32.xlu1 %v3680_v47, %s3438_s17 }
  0x2c   : > { %980 = vrot.lane.b32.xlu0 %v3691_v49, %s3438_s17 }
  0x2d   : > { %982 = vrot.lane.b32.xlu1 %v3696_v50, %s3438_s17 }
  0x2f   : > { %2979 = vmatmul.mubr.msk.bf16.gmra.mrb[12].mxu0 %vm5030_vm5, %v3335_v48  ;;  %vm1300_vm5 = vcmask 908288  }
  0x30   : > { %984 = vrot.lane.b32.xlu0 %v3706_v51, %s3438_s17 }
  0x31   : > { %986 = vrot.lane.b32.xlu1 %v3713_v52, %s3438_s17 }
  0x86   : > { %v899_v53 = vpop.permute.xlu0 %898 }
  0x87   : > { %v903_v54 = vpop.permute.xlu1 %902 }
  0x8a   : > { %v901_v55 = vpop.permute.xlu0 %900 }
  0x8b   : > { %v931_v56 = vsel %vm930_vm11, %v899_v53, %v901_v55  ;;  %v905_v58 = vpop.permute.xlu1 %904 }
  0x8c   : > { %1599 = vmatprep.subr.bf16.mxu1 %v931_v56  ;;  %v932_v59 = vsel %vm930_vm11, %v903_v54, %v905_v58 }
  0x8d   : > { %3057 = vmatpush1.bf16.msk.msra.mxu1 %vm3719_vm12, %v899_v53 }
  0x8e   : > { %1601 = vmatprep.subr.bf16.mxu1 %v932_v59  ;;  %v907_v61 = vpop.permute.xlu0 %906 }
  0x8f   : > { %v909_v60 = vpop.permute.xlu1 %908 }
  0x90   : > { %v933_v62 = vsel %vm930_vm11, %v907_v61, %v909_v60 }
  0x91   : > { %3059 = vmatpush1.bf16.msk.msra.mxu1 %vm3719_vm12, %v903_v54 }
  0x92   : > { %1603 = vmatprep.subr.bf16.mxu1 %v933_v62  ;;  %v911_v0 = vpop.permute.xlu0 %910 }
  0x93   : > { %v913_v63 = vpop.permute.xlu1 %912 }
  0x94   : > { %v934_v1 = vsel %vm930_vm11, %v911_v0, %v913_v63 }
  0x95   : > { %3061 = vmatpush1.bf16.msk.msra.mxu1 %vm3719_vm12, %v907_v61 }
  0x96   : > { %1605 = vmatprep.subr.bf16.mxu1 %v934_v1 }
  0x99   : > { %3063 = vmatpush1.bf16.msk.msra.mxu1 %vm3719_vm12, %v911_v0 }
  0xea   : > { %v479_v2 = vpop.f32.mrb[0].mxu0 }
  0xeb   : > { %v481_v4 = vpop.f32.mrb[1].mxu0 }
  0xec   : > { %v483_v5 = vpop.f32.mrb[2].mxu0 }
  0xed   : > { %v3734_v6 = vpack.c.bf16 %v483_v5, %v479_v2  ;;  %v485_v7 = vpop.f32.mrb[3].mxu0 }
  0xee   : > { %v3736_v8 = vpack.c.bf16 %v485_v7, %v481_v4 }
  0xef   : > { %v3741_v9 = vsel %vm657_vm6, %v3734_v6, 0  ;;  %v3755_v13 = vsel %vm691_vm9, %v3734_v6, 0 }
  0xf0   : > { %914 = vrot.lane.b32.xlu0 %v3741_v9, %s3437_s16  ;;  %v3748_v10 = vsel %vm658_vm7, %v3736_v8, 0  ;;  %v3762_v15 = vsel %vm692_vm10, %v3736_v8, 0 }
  0xf1   : > { %916 = vrot.lane.b32.xlu1 %v3748_v10, %s3437_s16 }
  0xf2   : > { %v489_v11 = vpop.f32.mrb[4].mxu0 }
  0xf3   : > { %v491_v12 = vpop.f32.mrb[5].mxu0 }
  0xf4   : > { %988 = vrot.lane.b32.xlu0 %v3755_v13, %s3438_s17  ;;  %v493_v14 = vpop.f32.mrb[6].mxu0 }
  0xf5   : > { %v3764_v16 = vpack.c.bf16 %v493_v14, %v489_v11  ;;  %990 = vrot.lane.b32.xlu1 %v3762_v15, %s3438_s17  ;;  %v495_v18 = vpop.f32.mrb[7].mxu0 }
  0xf6   : > { %v3768_v20 = vpack.c.bf16 %v495_v18, %v491_v12  ;;  %v3350_v12 = vld [vmem:[%s5023_s3 + $0xc] ss:$36 sps:$4 sm:$0xff]   ;;  %v3925_v18 = vpop.permute.xlu0 %972 }
  0xf7   : > { %v3773_v24 = vsel %vm657_vm6, %v3764_v16, 0  ;;  %v3787_v43 = vsel %vm691_vm9, %v3764_v16, 0  ;;  %1631 = vmatprep.mubr.bf16.mxu1 %v3350_v12 }
  0xf8   : > { %918 = vrot.lane.b32.xlu0 %v3773_v24, %s3437_s16  ;;  %v3780_v25 = vsel %vm658_vm7, %v3768_v20, 0  ;;  %v3794_v53 = vsel %vm692_vm10, %v3768_v20, 0 }
  0xf9   : > { %920 = vrot.lane.b32.xlu1 %v3780_v25, %s3437_s16 }
  0xfa   : > { %v499_v35 = vpop.f32.mrb[8].mxu0 }
  0xfb   : > { %v501_v36 = vpop.f32.mrb[9].mxu0 }
  0xfc   : > { %992 = vrot.lane.b32.xlu0 %v3787_v43, %s3438_s17  ;;  %v503_v48 = vpop.f32.mrb[10].mxu0 }
  0xfd   : > { %v3796_v54 = vpack.c.bf16 %v503_v48, %v499_v35  ;;  %994 = vrot.lane.b32.xlu1 %v3794_v53, %s3438_s17  ;;  %v505_v55 = vpop.f32.mrb[11].mxu0  ;;  %v3927_v35 = vpop.permute.xlu1 %974 }
  0xfe   : > { %v3800_v56 = vpack.c.bf16 %v505_v55, %v501_v36  ;;  %v3935_v36 = vpop.permute.xlu0 %976 }
  0xff   : > { %v3805_v58 = vsel %vm657_vm6, %v3796_v54, 0  ;;  %v3819_v62 = vsel %vm691_vm9, %v3796_v54, 0 }
 0x100   : > { %922 = vrot.lane.b32.xlu0 %v3805_v58, %s3437_s16  ;;  %v3812_v59 = vsel %vm658_vm7, %v3800_v56, 0  ;;  %v3826_v0 = vsel %vm692_vm10, %v3800_v56, 0 }
 0x101   : > { %924 = vrot.lane.b32.xlu1 %v3812_v59, %s3437_s16 }
 0x102   : > { %v509_v60 = vpop.f32.mrb[12].mxu0  ;;  %v3945_v48 = vpop.permute.xlu0 %980 }
 0x103   : > { %v511_v61 = vpop.f32.mrb[13].mxu0 }
 0x104   : > { %996 = vrot.lane.b32.xlu0 %v3819_v62, %s3438_s17  ;;  %v513_v63 = vpop.f32.mrb[14].mxu0 }
 0x105   : > { %v3828_v1 = vpack.c.bf16 %v513_v63, %v509_v60  ;;  %998 = vrot.lane.b32.xlu1 %v3826_v0, %s3438_s17  ;;  %v515_v2 = vpop.f32.mrb[15].mxu0 }
 0x106   : > { %v3832_v4 = vpack.c.bf16 %v515_v2, %v511_v61 }
 0x107   : > { %v3837_v5 = vsel %vm657_vm6, %v3828_v1, 0  ;;  %v3855_v11 = vsel %vm691_vm9, %v3828_v1, 0 }
 0x108   : > { %926 = vrot.lane.b32.xlu0 %v3837_v5, %s3437_s16  ;;  %v3844_v7 = vsel %vm658_vm7, %v3832_v4, 0  ;;  %v3889_v14 = vsel %vm692_vm10, %v3832_v4, 0 }
 0x109   : > { %928 = vrot.lane.b32.xlu1 %v3844_v7, %s3437_s16 }
 0x10c   : > { %1046 = vrot.lane.b32.xlu0 %v3575_v27, %s3439_s18 }
 0x10d   : > { %1048 = vrot.lane.b32.xlu1 %v3600_v31, %s3439_s18 }
 0x110   : > { %1000 = vrot.lane.b32.xlu0 %v3855_v11, %s3438_s17 }
 0x111   : > { %1052 = vrot.lane.b32.xlu1 %v3605_v32, %s3439_s18 }
 0x114   : > { %1050 = vrot.lane.b32.xlu0 %v3580_v28, %s3439_s18 }
 0x115   : > { %1056 = vrot.lane.b32.xlu1 %v3623_v37, %s3439_s18 }
 0x118   : > { %1054 = vrot.lane.b32.xlu0 %v3628_v38, %s3439_s18 }
 0x119   : > { %1060 = vrot.lane.b32.xlu1 %v3641_v41, %s3439_s18 }
 0x11c   : > { %1058 = vrot.lane.b32.xlu0 %v3646_v42, %s3439_s18 }
 0x11d   : > { %1064 = vrot.lane.b32.xlu1 %v3748_v10, %s3439_s18 }
 0x120   : > { %1062 = vrot.lane.b32.xlu0 %v3741_v9, %s3439_s18 }
 0x121   : > { %1068 = vrot.lane.b32.xlu1 %v3780_v25, %s3439_s18 }
 0x124   : > { %1066 = vrot.lane.b32.xlu0 %v3773_v24, %s3439_s18 }
 0x125   : > { %1072 = vrot.lane.b32.xlu1 %v3812_v59, %s3439_s18 }
 0x128   : > { %1070 = vrot.lane.b32.xlu0 %v3805_v58, %s3439_s18 }
 0x129   : > { %1002 = vrot.lane.b32.xlu1 %v3889_v14, %s3438_s17 }
 0x12c   : > { %1074 = vrot.lane.b32.xlu0 %v3837_v5, %s3439_s18 }
 0x12d   : > { %1122 = vrot.lane.b32.xlu1 %v3665_v45, %s3440_s21 }
 0x130   : > { %1120 = vrot.lane.b32.xlu0 %v3660_v44, %s3440_s21 }
 0x131   : > { %1126 = vrot.lane.b32.xlu1 %v3680_v47, %s3440_s21 }
 0x134   : > { %1124 = vrot.lane.b32.xlu0 %v3675_v46, %s3440_s21 }
 0x135   : > { %1130 = vrot.lane.b32.xlu1 %v3696_v50, %s3440_s21 }
 0x138   : > { %1128 = vrot.lane.b32.xlu0 %v3691_v49, %s3440_s21 }
 0x139   : > { %1134 = vrot.lane.b32.xlu1 %v3713_v52, %s3440_s21 }
 0x13c   : > { %1132 = vrot.lane.b32.xlu0 %v3706_v51, %s3440_s21 }
 0x13d   : > { %1138 = vrot.lane.b32.xlu1 %v3762_v15, %s3440_s21 }
 0x140   : > { %1136 = vrot.lane.b32.xlu0 %v3755_v13, %s3440_s21 }
 0x141   : > { %1142 = vrot.lane.b32.xlu1 %v3794_v53, %s3440_s21 }
 0x144   : > { %1140 = vrot.lane.b32.xlu0 %v3787_v43, %s3440_s21 }
 0x145   : > { %1146 = vrot.lane.b32.xlu1 %v3826_v0, %s3440_s21 }
 0x148   : > { %1144 = vrot.lane.b32.xlu0 %v3819_v62, %s3440_s21 }
 0x149   : > { %727 = vrot.lane.b32.xlu1 %v3665_v45, %s3441_s22  ;;  %v3939_v45 = vpop.permute.xlu1 %978 }
 0x14c   : > { %1148 = vrot.lane.b32.xlu0 %v3855_v11, %s3440_s21 }
 0x14d   : > { %1196 = vrot.lane.b32.xlu1 %v3555_v22, %s3442_s23  ;;  %v3947_v55 = vpop.permute.xlu1 %982 }
 0x150   : > { %725 = vrot.lane.b32.xlu0 %v3660_v44, %s3441_s22  ;;  %v3955_v44 = vpop.permute.xlu0 %984 }
 0x151   : > { %731 = vrot.lane.b32.xlu1 %v3680_v47, %s3441_s22  ;;  %v3959_v47 = vpop.permute.xlu1 %986 }
 0x154   : > { %1194 = vrot.lane.b32.xlu0 %v3545_v17, %s3442_s23 }
 0x155   : > { %1200 = vrot.lane.b32.xlu1 %v3568_v26, %s3442_s23 }
 0x158   : > { %729 = vrot.lane.b32.xlu0 %v3675_v46, %s3441_s22 }
 0x159   : > { %735 = vrot.lane.b32.xlu1 %v3696_v50, %s3441_s22 }
 0x15c   : > { %1198 = vrot.lane.b32.xlu0 %v3549_v19, %s3442_s23 }
 0x15d   : > { %1204 = vrot.lane.b32.xlu1 %v3583_v29, %s3442_s23 }
 0x160   : > { %733 = vrot.lane.b32.xlu0 %v3691_v49, %s3441_s22 }
 0x161   : > { %739 = vrot.lane.b32.xlu1 %v3713_v52, %s3441_s22 }
 0x162   : > { %v915_v46 = vpop.permute.xlu0 %914 }
 0x163   : > { %v917_v60 = vpop.permute.xlu1 %916 }
 0x164   : > { %1202 = vrot.lane.b32.xlu0 %v3586_v30, %s3442_s23  ;;  %v935_v50 = vsel %vm930_vm11, %v915_v46, %v917_v60 }
 0x165   : > { %1607 = vmatprep.subr.bf16.mxu1 %v935_v50  ;;  %1208 = vrot.lane.b32.xlu1 %v3609_v33, %s3442_s23 }
 0x166   : > { %v3970_v61 = vpop.permute.xlu0 %988  ;;  %3065 = vmatpush1.bf16.msk.msra.mxu1 %vm3719_vm12, %v915_v46 }
 0x167   : > { %v3974_v49 = vpop.permute.xlu1 %990 }
 0x168   : > { %737 = vrot.lane.b32.xlu0 %v3706_v51, %s3441_s22 }
 0x169   : > { %743 = vrot.lane.b32.xlu1 %v3762_v15, %s3441_s22 }
 0x16a   : > { %v919_v52 = vpop.permute.xlu0 %918 }
 0x16b   : > { %v921_v63 = vpop.permute.xlu1 %920 }
 0x16c   : > { %1206 = vrot.lane.b32.xlu0 %v3612_v34, %s3442_s23  ;;  %v936_v2 = vsel %vm930_vm11, %v919_v52, %v921_v63 }
 0x16d   : > { %1609 = vmatprep.subr.bf16.mxu1 %v936_v2  ;;  %1076 = vrot.lane.b32.xlu1 %v3844_v7, %s3439_s18 }
 0x16e   : > { %v3985_v12 = vpop.permute.xlu0 %992  ;;  %3067 = vmatpush1.bf16.msk.msra.mxu1 %vm3719_vm12, %v919_v52 }
 0x16f   : > { %v995_v51 = vpop.permute.xlu1 %994 }
 0x170   : > { %741 = vrot.lane.b32.xlu0 %v3755_v13, %s3441_s22 }
 0x171   : > { %1212 = vrot.lane.b32.xlu1 %v3736_v8, %s3442_s23 }
 0x172   : > { %v923_v15 = vpop.permute.xlu0 %922 }
 0x173   : > { %v925_v46 = vpop.permute.xlu1 %924 }
 0x174   : > { %1210 = vrot.lane.b32.xlu0 %v3734_v6, %s3442_s23  ;;  %v937_v60 = vsel %vm930_vm11, %v923_v15, %v925_v46  ;;  %v3405_v46 = vld [vmem:[%s5026_s6 + $0x28] ss:$20 sps:$4 sm:$0xff]  }
 0x175   : > { %1611 = vmatprep.subr.bf16.mxu1 %v937_v60  ;;  %747 = vrot.lane.b32.xlu1 %v3794_v53, %s3441_s22 }
 0x176   : > { %v3998_v50 = vpop.permute.xlu0 %996  ;;  %3069 = vmatpush1.bf16.msk.msra.mxu1 %vm3719_vm12, %v923_v15 }
 0x177   : > { %v999_v13 = vpop.permute.xlu1 %998 }
 0x178   : > { %745 = vrot.lane.b32.xlu0 %v3787_v43, %s3441_s22  ;;  %v1005_v43 = vsel %vm1004_vm13, %v3925_v18, %v3927_v35  ;;  %v1006_v35 = vsel %vm1004_vm13, %v3935_v36, %v3939_v45 }
 0x179   : > { %1216 = vrot.lane.b32.xlu1 %v3768_v20, %s3442_s23 }
 0x17a   : > { %v927_v52 = vpop.permute.xlu0 %926 }
 0x17b   : > { %v929_v63 = vpop.permute.xlu1 %928 }
 0x17c   : > { %1214 = vrot.lane.b32.xlu0 %v3764_v16, %s3442_s23  ;;  %v938_v53 = vsel %vm930_vm11, %v927_v52, %v929_v63 }
 0x17d   : > { %751 = vrot.lane.b32.xlu1 %v3826_v0, %s3441_s22  ;;  %1613 = vmatprep.subr.bf16.mxu1 %v938_v53 }
 0x17e   : > { %v4011_v2 = vpop.permute.xlu0 %1046  ;;  %3071 = vmatpush1.bf16.msk.msra.mxu1 %vm3719_vm12, %v927_v52 }
 0x17f   : > { %1615 = vmatprep.subr.bf16.mxu1 %v1005_v43  ;;  %v4018_v15 = vpop.permute.xlu1 %1048 }
 0x180   : > { %749 = vrot.lane.b32.xlu0 %v3819_v62, %s3441_s22 }
 0x181   : > { %1220 = vrot.lane.b32.xlu1 %v3800_v56, %s3442_s23 }
 0x182   : > { %v1001_v0 = vpop.permute.xlu0 %1000  ;;  %3073 = vmatpush1.bf16.msk.msra.mxu1 %vm4021_vm14, %v3925_v18  ;;  %v1007_v18 = vsel %vm1004_vm13, %v3945_v48, %v3947_v55 }
 0x183   : > { %1617 = vmatprep.subr.bf16.mxu1 %v1006_v35  ;;  %v4035_v60 = vpop.permute.xlu1 %1052 }
 0x184   : > { %1218 = vrot.lane.b32.xlu0 %v3796_v54, %s3442_s23 }
 0x185   : > { %1224 = vrot.lane.b32.xlu1 %v3832_v4, %s3442_s23 }
 0x186   : > { %v4041_v62 = vpop.permute.xlu0 %1050  ;;  %3075 = vmatpush1.bf16.msk.msra.mxu1 %vm4021_vm14, %v3935_v36  ;;  %v1008_v36 = vsel %vm1004_vm13, %v3955_v44, %v3959_v47 }
 0x187   : > { %1619 = vmatprep.subr.bf16.mxu1 %v1007_v18  ;;  %v4049_v45 = vpop.permute.xlu1 %1056 }
 0x188   : > { %753 = vrot.lane.b32.xlu0 %v3855_v11, %s3441_s22 }
 0x189   : > { %810 = vrot.lane.b32.xlu1 %v3555_v22, %s3443_s24 }
 0x18a   : > { %v4055_v52 = vpop.permute.xlu0 %1054  ;;  %3077 = vmatpush1.bf16.msk.msra.mxu1 %vm4021_vm14, %v3945_v48  ;;  %v1009_v48 = vsel %vm1004_vm13, %v3970_v61, %v3974_v49 }
 0x18b   : > { %1621 = vmatprep.subr.bf16.mxu1 %v1008_v36  ;;  %v4063_v55 = vpop.permute.xlu1 %1060 }
 0x18c   : > { %1222 = vrot.lane.b32.xlu0 %v3828_v1, %s3442_s23 }
 0x18d   : > { %1150 = vrot.lane.b32.xlu1 %v3889_v14, %s3440_s21 }
 0x18e   : > { %v4069_v11 = vpop.permute.xlu0 %1058  ;;  %3079 = vmatpush1.bf16.msk.msra.mxu1 %vm4021_vm14, %v3955_v44  ;;  %v1010_v44 = vsel %vm1004_vm13, %v3985_v12, %v995_v51 }
 0x18f   : > { %1623 = vmatprep.subr.bf16.mxu1 %v1009_v48  ;;  %v4077_v47 = vpop.permute.xlu1 %1064 }
 0x190   : > { %808 = vrot.lane.b32.xlu0 %v3545_v17, %s3443_s24 }
 0x191   : > { %1270 = vrot.lane.b32.xlu1 %v3600_v31, %s3444_s25  ;;  %v1011_v31 = vsel %vm1004_vm13, %v3998_v50, %v999_v13 }
 0x192   : > { %v4083_v63 = vpop.permute.xlu0 %1062  ;;  %3081 = vmatpush1.bf16.msk.msra.mxu1 %vm4021_vm14, %v3970_v61 }
 0x193   : > { %1625 = vmatprep.subr.bf16.mxu1 %v1010_v44  ;;  %v4090_v49 = vpop.permute.xlu1 %1068 }
 0x194   : > { %1268 = vrot.lane.b32.xlu0 %v3575_v27, %s3444_s25 }
 0x195   : > { %814 = vrot.lane.b32.xlu1 %v3568_v26, %s3443_s24 }
 0x196   : > { %v4096_v53 = vpop.permute.xlu0 %1066  ;;  %3083 = vmatpush1.bf16.msk.msra.mxu1 %vm4021_vm14, %v3985_v12 }
 0x197   : > { %1627 = vmatprep.subr.bf16.mxu1 %v1011_v31  ;;  %v4103_v61 = vpop.permute.xlu1 %1072 }
 0x198   : > { %812 = vrot.lane.b32.xlu0 %v3549_v19, %s3443_s24 }
 0x199   : > { %1274 = vrot.lane.b32.xlu1 %v3605_v32, %s3444_s25  ;;  %v3348_v32 = vld [vmem:[%s5023_s3 + $0x8] ss:$36 sps:$4 sm:$0xff]  }
 0x19a   : > { %v4109_v27 = vpop.permute.xlu0 %1070  ;;  %3085 = vmatpush1.bf16.msk.msra.mxu1 %vm4021_vm14, %v3998_v50  ;;  %v3351_v50 = vld [vmem:[%s5023_s3 + $0x54] ss:$36 sps:$4 sm:$0xff]  }
 0x19b   : > { %v1003_v51 = vpop.permute.xlu1 %1002 }
 0x19c   : > { %1272 = vrot.lane.b32.xlu0 %v3580_v28, %s3444_s25  ;;  %v1012_v12 = vsel %vm1004_vm13, %v1001_v0, %v1003_v51 }
 0x19d   : > { %818 = vrot.lane.b32.xlu1 %v3583_v29, %s3443_s24  ;;  %1629 = vmatprep.subr.bf16.mxu1 %v1012_v12  ;;  %v1892_v12 = vld [vmem:[%s5024_s4 + $0x8] sm:$0xff] }
 0x19e   : > { %v4122_v13 = vpop.permute.xlu0 %1074  ;;  %3087 = vmatpush1.bf16.msk.msra.mxu1 %vm4021_vm14, %v1001_v0 }
 0x19f   : > { %v4129_v28 = vpop.permute.xlu1 %1122  ;;  %1672 = vmatprep.subr.bf16.mxu1 %v3555_v22  ;;  %v3353_v22 = vld [vmem:[%s5023_s3 + $0x50] ss:$36 sps:$4 sm:$0xff]  }
 0x1a0   : > { %816 = vrot.lane.b32.xlu0 %v3586_v30, %s3443_s24 }
 0x1a1   : > { %1278 = vrot.lane.b32.xlu1 %v3623_v37, %s3444_s25  ;;  %1632 = vmatmul.mubr.bf16.vlgmr.msra.gmra.mrb[0].mxu1 %v3348_v32 }
 0x1a2   : > { %v4136_v43 = vpop.permute.xlu0 %1120  ;;  %1673 = vmatpush1.bf16.msra.mxu1 %v3545_v17  ;;  %1641 = vmatprep.mubr.bf16.mxu1 %v3351_v50  ;;  %v3354_v17 = vld [vmem:[%s5023_s3 + $0x9c] ss:$36 sps:$4 sm:$0xff]  }
 0x1a3   : > { %v4139_v0 = vpop.permute.xlu1 %1126  ;;  %1674 = vmatprep.subr.bf16.mxu1 %v3568_v26  ;;  %v1955_v50 = vld [vmem:[%s5025_s5] sm:$0xff] }
 0x1a4   : > { %1276 = vrot.lane.b32.xlu0 %v3628_v38, %s3444_s25 }
 0x1a5   : > { %822 = vrot.lane.b32.xlu1 %v3609_v33, %s3443_s24 }
 0x1a6   : > { %v4149_v37 = vpop.permute.xlu0 %1124  ;;  %1675 = vmatpush1.bf16.msra.mxu1 %v3549_v19 }
 0x1a7   : > { %v4155_v35 = vpop.permute.xlu1 %1130  ;;  %1676 = vmatprep.subr.bf16.mxu1 %v3583_v29  ;;  %v3356_v29 = vld [vmem:[%s5023_s3 + $0x98] ss:$36 sps:$4 sm:$0xff]  }
 0x1a8   : > { %820 = vrot.lane.b32.xlu0 %v3612_v34, %s3443_s24 }
 0x1a9   : > { %755 = vrot.lane.b32.xlu1 %v3889_v14, %s3441_s22  ;;  %1642 = vmatmul.mubr.bf16.gmra.mrb[4].mxu1 %v3353_v22 }
 0x1aa   : > { %v4162_v26 = vpop.permute.xlu0 %1128  ;;  %1677 = vmatpush1.bf16.msra.mxu1 %v3586_v30  ;;  %1651 = vmatprep.mubr.bf16.mxu1 %v3354_v17  ;;  %v3357_v30 = vld [vmem:[%s5023_s3 + $0xe4] ss:$36 sps:$4 sm:$0xff]   ;;  %v3360_v17 = vld [vmem:[%s5023_s3 + $0x10] ss:$36 sps:$4 sm:$0xff]  }
 0x1ab   : > { %v4165_v19 = vpop.permute.xlu1 %1134  ;;  %1678 = vmatprep.subr.bf16.mxu1 %v3609_v33 }
 0x1ac   : > { %1280 = vrot.lane.b32.xlu0 %v3646_v42, %s3444_s25  ;;  %v3359_v42 = vld [vmem:[%s5023_s3 + $0xe0] ss:$36 sps:$4 sm:$0xff]  }
 0x1ad   : > { %1282 = vrot.lane.b32.xlu1 %v3641_v41, %s3444_s25 }
 0x1ae   : > { %v4175_v38 = vpop.permute.xlu0 %1132  ;;  %1679 = vmatpush1.bf16.msra.mxu1 %v3612_v34 }
 0x1af   : > { %1680 = vmatprep.subr.bf16.mxu1 %v3736_v8  ;;  %v4182_v33 = vpop.permute.xlu1 %1138 }
 0x1b0   : > { %824 = vrot.lane.b32.xlu0 %v3734_v6, %s3443_s24 }
 0x1b1   : > { %826 = vrot.lane.b32.xlu1 %v3736_v8, %s3443_s24  ;;  %1652 = vmatmul.mubr.bf16.gmra.mrb[8].mxu1 %v3356_v29 }
 0x1b2   : > { %v4188_v41 = vpop.permute.xlu0 %1136  ;;  %1681 = vmatpush1.bf16.msra.mxu1 %v3734_v6  ;;  %1661 = vmatprep.mubr.bf16.mxu1 %v3357_v30  ;;  %v3362_v6 = vld [vmem:[%s5023_s3 + $0x14] ss:$36 sps:$4 sm:$0xff]   ;;  %v3363_v30 = vld [vmem:[%s5023_s3 + $0x5c] ss:$36 sps:$4 sm:$0xff]  }
 0x1b3   : > { %1682 = vmatprep.subr.bf16.mxu1 %v3768_v20  ;;  %v4192_v34 = vpop.permute.xlu1 %1142 }
 0x1b4   : > { %1284 = vrot.lane.b32.xlu0 %v3741_v9, %s3444_s25 }
 0x1b5   : > { %1286 = vrot.lane.b32.xlu1 %v3748_v10, %s3444_s25 }
 0x1b6   : > { %v4201_v8 = vpop.permute.xlu0 %1140  ;;  %1683 = vmatpush1.bf16.msra.mxu1 %v3764_v16 }
 0x1b7   : > { %1684 = vmatprep.subr.bf16.mxu1 %v3800_v56  ;;  %v4208_v14 = vpop.permute.xlu1 %1146 }
 0x1b8   : > { %828 = vrot.lane.b32.xlu0 %v3764_v16, %s3443_s24 }
 0x1b9   : > { %830 = vrot.lane.b32.xlu1 %v3768_v20, %s3443_s24  ;;  %1662 = vmatmul.mubr.bf16.gmra.mrb[12].mxu1 %v3359_v42  ;;  %v3386_v20 = vld [vmem:[%s5023_s3 + $0x4] ss:$36 sps:$4 sm:$0xff]  }
 0x1ba   : > { %v4214_v9 = vpop.permute.xlu0 %1144  ;;  %1685 = vmatpush1.bf16.msra.mxu1 %v3796_v54  ;;  %1704 = vmatprep.mubr.bf16.mxu1 %v3362_v6  ;;  %v1153_v6 = vsel %vm1152_vm2, %v4136_v43, %v4129_v28  ;;  %v1154_v43 = vsel %vm1152_vm2, %v4149_v37, %v4139_v0 }
 0x1bb   : > { %1686 = vmatprep.subr.bf16.mxu1 %v3832_v4  ;;  %v728_v10 = vpop.permute.xlu1 %727  ;;  %1558 = vmatprep.mubr.bf16.mxu0 %v3386_v20  ;;  %v1893_v20 = vld [vmem:[%s5024_s4 + $0x10] sm:$0xff] }
 0x1bc   : > { %1288 = vrot.lane.b32.xlu0 %v3773_v24, %s3444_s25  ;;  %v1079_v24 = vsel %vm1078_vm15, %v4011_v2, %v4018_v15 }
 0x1bd   : > { %1290 = vrot.lane.b32.xlu1 %v3780_v25, %s3444_s25 }
 0x1be   : > { %v4222_v16 = vpop.permute.xlu0 %1148  ;;  %1687 = vmatpush1.bf16.msra.mxu1 %v3828_v1 }
 0x1bf   : > { %3088 = vmatprep.subr.msk.bf16.mxu1 %vm1078_vm15, %v4018_v15  ;;  %v4230_v18 = vpop.permute.xlu1 %1196 }
 0x1c0   : > { %832 = vrot.lane.b32.xlu0 %v3796_v54, %s3443_s24 }
 0x1c1   : > { %834 = vrot.lane.b32.xlu1 %v3800_v56, %s3443_s24  ;;  %v1080_v56 = vsel %vm1078_vm15, %v4041_v62, %v4035_v60 }
 0x1c2   : > { %v726_v25 = vpop.permute.xlu0 %725  ;;  %1689 = vmatpush1.bf16.msra.mxu1 %v1079_v24 }
 0x1c3   : > { %3089 = vmatprep.subr.msk.bf16.mxu1 %vm1078_vm15, %v4035_v60  ;;  %v732_v48 = vpop.permute.xlu1 %731  ;;  %v758_v54 = vsel %vm757_vm0, %v726_v25, %v728_v10  ;;  %v1894_v10 = vld [vmem:[%s5024_s4 + $0x18] sm:$0xff] }
 0x1c4   : > { %1292 = vrot.lane.b32.xlu0 %v3805_v58, %s3444_s25  ;;  %1526 = vmatprep.subr.bf16.mxu0 %v758_v54  ;;  %v1081_v58 = vsel %vm1078_vm15, %v4055_v52, %v4049_v45  ;;  %v1957_v54 = vld [vmem:[%s5025_s5 + $0x10] sm:$0xff] }
 0x1c5   : > { %1294 = vrot.lane.b32.xlu1 %v3812_v59, %s3444_s25  ;;  %3025 = vmatpush1.bf16.msk.msra.mxu0 %vm4240_vm1, %v726_v25  ;;  %v3365_v25 = vld [vmem:[%s5023_s3 + $0x58] ss:$36 sps:$4 sm:$0xff]  }
 0x1c6   : > { %v4256_v2 = vpop.permute.xlu0 %1194  ;;  %1691 = vmatpush1.bf16.msra.mxu1 %v1080_v56 }
 0x1c7   : > { %3090 = vmatprep.subr.msk.bf16.mxu1 %vm1078_vm15, %v4049_v45  ;;  %v4260_v15 = vpop.permute.xlu1 %1200 }
 0x1c8   : > { %836 = vrot.lane.b32.xlu0 %v3828_v1, %s3443_s24  ;;  %v1082_v1 = vsel %vm1078_vm15, %v4069_v11, %v4063_v55  ;;  %v1084_v11 = vsel %vm1078_vm15, %v4096_v53, %v4090_v49  ;;  %v1891_v53 = vld [vmem:[%s5024_s4] sm:$0xff] }
 0x1c9   : > { %838 = vrot.lane.b32.xlu1 %v3832_v4, %s3443_s24 }
 0x1ca   : > { %v730_v59 = vpop.permute.xlu0 %729  ;;  %1693 = vmatpush1.bf16.msra.mxu1 %v1081_v58 }
 0x1cb   : > { %3091 = vmatprep.subr.msk.bf16.mxu1 %vm1078_vm15, %v4063_v55  ;;  %v736_v60 = vpop.permute.xlu1 %735  ;;  %v759_v62 = vsel %vm757_vm0, %v730_v59, %v732_v48  ;;  %v1958_v48 = vld [vmem:[%s5025_s5 + $0x18] sm:$0xff] }
 0x1cc   : > { %1296 = vrot.lane.b32.xlu0 %v3837_v5, %s3444_s25  ;;  %1528 = vmatprep.subr.bf16.mxu0 %v759_v62  ;;  %v1083_v5 = vsel %vm1078_vm15, %v4083_v63, %v4077_v47  ;;  %v1085_v63 = vsel %vm1078_vm15, %v4109_v27, %v4103_v61  ;;  %v1895_v62 = vld [vmem:[%s5024_s4 + $0x20] sm:$0xff] }
 0x1cd   : > { %1298 = vrot.lane.b32.xlu1 %v3844_v7, %s3444_s25  ;;  %3027 = vmatpush1.bf16.msk.msra.mxu0 %vm4240_vm1, %v730_v59  ;;  %v1155_v59 = vsel %vm1152_vm2, %v4162_v26, %v4155_v35  ;;  %v1156_v26 = vsel %vm1152_vm2, %v4175_v38, %v4165_v19 }
 0x1ce   : > { %v4281_v4 = vpop.permute.xlu0 %1198  ;;  %1695 = vmatpush1.bf16.msra.mxu1 %v1082_v1 }
 0x1cf   : > { %3092 = vmatprep.subr.msk.bf16.mxu1 %vm1078_vm15, %v4077_v47  ;;  %v4285_v45 = vpop.permute.xlu1 %1204 }
 0x1d0   : > { %1901 = vperm.xlu0 %3318, %v1891_v53   ;;  %v3371_v53 = vld [vmem:[%s5023_s3 + $0xe8] ss:$36 sps:$4 sm:$0xff]  }
 0x1d1   : > { %1906 = vperm.xlu1 %3319, %v1892_v12   ;;  %v1962_v12 = vld [vmem:[%s5025_s5 + $0x38] sm:$0xff] }
 0x1d2   : > { %v734_v52 = vpop.permute.xlu0 %733  ;;  %1697 = vmatpush1.bf16.msra.mxu1 %v1083_v5  ;;  %v3368_v5 = vld [vmem:[%s5023_s3 + $0xa0] ss:$36 sps:$4 sm:$0xff]  }
 0x1d3   : > { %3093 = vmatprep.subr.msk.bf16.mxu1 %vm1078_vm15, %v4090_v49  ;;  %v740_v7 = vpop.permute.xlu1 %739  ;;  %v760_v55 = vsel %vm757_vm0, %v734_v52, %v736_v60  ;;  %v1896_v60 = vld [vmem:[%s5024_s4 + $0x28] sm:$0xff] }
 0x1d4   : > { %1530 = vmatprep.subr.bf16.mxu0 %v760_v55 }
 0x1d5   : > { %3029 = vmatpush1.bf16.msk.msra.mxu0 %vm4240_vm1, %v734_v52  ;;  %1965 = vperm.xlu1 %3319, %v1955_v50   ;;  %v1960_v52 = vld [vmem:[%s5025_s5 + $0x28] sm:$0xff] }
 0x1d6   : > { %v4298_v44 = vpop.permute.xlu0 %1202  ;;  %1699 = vmatpush1.bf16.msra.mxu1 %v1084_v11 }
 0x1d7   : > { %3094 = vmatprep.subr.msk.bf16.mxu1 %vm1078_vm15, %v4103_v61  ;;  %v4302_v47 = vpop.permute.xlu1 %1208  ;;  %v1956_v61 = vld [vmem:[%s5025_s5 + $0x8] sm:$0xff] }
 0x1d8   : > { %1970 = vperm.xlu0 %3318, %v1956_v61   ;;  %v1961_v61 = vld [vmem:[%s5025_s5 + $0x30] sm:$0xff] }
 0x1d9   : > { %1911 = vperm.xlu1 %3319, %v1893_v20  }
 0x1da   : > { %v738_v31 = vpop.permute.xlu0 %737  ;;  %1701 = vmatpush1.bf16.msra.mxu1 %v1085_v63  ;;  %v1157_v63 = vsel %vm1152_vm2, %v4188_v41, %v4182_v33  ;;  %v1158_v41 = vsel %vm1152_vm2, %v4201_v8, %v4192_v34  ;;  %v1159_v8 = vsel %vm1152_vm2, %v4214_v9, %v4208_v14 }
 0x1db   : > { %v744_v51 = vpop.permute.xlu1 %743  ;;  %v761_v49 = vsel %vm757_vm0, %v738_v31, %v740_v7  ;;  %v1959_v7 = vld [vmem:[%s5025_s5 + $0x20] sm:$0xff] }
 0x1dc   : > { %1532 = vmatprep.subr.bf16.mxu0 %v761_v49  ;;  %1916 = vperm.xlu0 %3318, %v1894_v10  }
 0x1dd   : > { %3031 = vmatpush1.bf16.msk.msra.mxu0 %vm4240_vm1, %v738_v31  ;;  %1975 = vperm.xlu1 %3319, %v1957_v54   ;;  %v1898_v31 = vld [vmem:[%s5024_s4 + $0x38] sm:$0xff] }
 0x1de   : > { %v4316_v32 = vpop.permute.xlu0 %1206 }
 0x1df   : > { %v1077_v27 = vpop.permute.xlu1 %1076 }
 0x1e0   : > { %3095 = vmatprep.subr.msk.bf16.mxu1 %vm1078_vm15, %v1077_v27  ;;  %v1086_v22 = vsel %vm1078_vm15, %v4122_v13, %v1077_v27  ;;  %1980 = vperm.xlu0 %3318, %v1958_v48   ;;  %v3374_v27 = vld [vmem:[%s5023_s3 + $0x1c] ss:$36 sps:$4 sm:$0xff]  }
 0x1e1   : > { %1703 = vmatpush1.bf16.msra.mxu1 %v1086_v22  ;;  %1921 = vperm.xlu1 %3319, %v1895_v62  }
 0x1e2   : > { %v742_v29 = vpop.permute.xlu0 %741  ;;  %3096 = vmatprep.subr.msk.bf16.mxu1 %vm1152_vm2, %v4129_v28 }
 0x1e3   : > { %v4335_v42 = vpop.permute.xlu1 %1212  ;;  %v762_v13 = vsel %vm757_vm0, %v742_v29, %v744_v51  ;;  %v1897_v51 = vld [vmem:[%s5024_s4 + $0x30] sm:$0xff] }
 0x1e4   : > { %1534 = vmatprep.subr.bf16.mxu0 %v762_v13  ;;  %1705 = vmatmul.mubr.bf16.vlgmr.msra.gmra.mrb[0].mxu1 %v3360_v17 }
 0x1e5   : > { %3033 = vmatpush1.bf16.msk.msra.mxu0 %vm4240_vm1, %v742_v29  ;;  %1746 = vmatpush1.bf16.msra.mxu1 %v1153_v6 }
 0x1e6   : > { %v4349_v24 = vpop.permute.xlu0 %1210  ;;  %3097 = vmatprep.subr.msk.bf16.mxu1 %vm1152_vm2, %v4139_v0  ;;  %1714 = vmatprep.mubr.bf16.mxu1 %v3363_v30  ;;  %v3366_v0 = vld [vmem:[%s5023_s3 + $0xa4] ss:$36 sps:$4 sm:$0xff]  }
 0x1e7   : > { %v748_v28 = vpop.permute.xlu1 %747  ;;  %1926 = vperm.xlu0 %3318, %v1896_v60   ;;  %1985 = vperm.xlu1 %3319, %v1959_v7   ;;  %v3375_v60 = vld [vmem:[%s5023_s3 + $0x64] ss:$36 sps:$4 sm:$0xff]  }
 0x1e9   : > { %1748 = vmatpush1.bf16.msra.mxu1 %v1154_v43 }
 0x1ea   : > { %v746_v56 = vpop.permute.xlu0 %745  ;;  %3098 = vmatprep.subr.msk.bf16.mxu1 %vm1152_vm2, %v4155_v35 }
 0x1eb   : > { %v4370_v37 = vpop.permute.xlu1 %1216  ;;  %v763_v58 = vsel %vm757_vm0, %v746_v56, %v748_v28  ;;  %1990 = vperm.xlu0 %3318, %v1960_v52   ;;  %1931 = vperm.xlu1 %3319, %v1897_v51  }
 0x1ec   : > { %1536 = vmatprep.subr.bf16.mxu0 %v763_v58  ;;  %1715 = vmatmul.mubr.bf16.gmra.mrb[4].mxu1 %v3365_v25 }
 0x1ed   : > { %3035 = vmatpush1.bf16.msk.msra.mxu0 %vm4240_vm1, %v746_v56  ;;  %1750 = vmatpush1.bf16.msra.mxu1 %v1155_v59  ;;  %v3372_v59 = vld [vmem:[%s5023_s3 + $0x18] ss:$36 sps:$4 sm:$0xff]  }
 0x1ee   : > { %v4384_v1 = vpop.permute.xlu0 %1214  ;;  %3099 = vmatprep.subr.msk.bf16.mxu1 %vm1152_vm2, %v4165_v19  ;;  %1724 = vmatprep.mubr.bf16.mxu1 %v3366_v0  ;;  %v3369_v19 = vld [vmem:[%s5023_s3 + $0xec] ss:$36 sps:$4 sm:$0xff]  }
 0x1ef   : > { %v752_v35 = vpop.permute.xlu1 %751  ;;  %1936 = vperm.xlu0 %3318, %v1898_v31   ;;  %1995 = vperm.xlu1 %3319, %v1961_v61   ;;  %v3381_v61 = vld [vmem:[%s5023_s3 + $0xf4] ss:$36 sps:$4 sm:$0xff]  }
 0x1f1   : > { %1752 = vmatpush1.bf16.msra.mxu1 %v1156_v26 }
 0x1f2   : > { %v750_v55 = vpop.permute.xlu0 %749  ;;  %3100 = vmatprep.subr.msk.bf16.mxu1 %vm1152_vm2, %v4182_v33 }
 0x1f3   : > { %v4405_v38 = vpop.permute.xlu1 %1220  ;;  %v764_v11 = vsel %vm757_vm0, %v750_v55, %v752_v35  ;;  %2000 = vperm.xlu0 %3318, %v1962_v12   ;;  %v3380_v12 = vld [vmem:[%s5023_s3 + $0xa8] ss:$36 sps:$4 sm:$0xff]  }
 0x1f4   : > { %1538 = vmatprep.subr.bf16.mxu0 %v764_v11  ;;  %1725 = vmatmul.mubr.bf16.gmra.mrb[8].mxu1 %v3368_v5 }
 0x1f5   : > { %3037 = vmatpush1.bf16.msk.msra.mxu0 %vm4240_vm1, %v750_v55  ;;  %1754 = vmatpush1.bf16.msra.mxu1 %v1157_v63 }
 0x1f6   : > { %v1219_v49 = vpop.permute.xlu0 %1218  ;;  %3101 = vmatprep.subr.msk.bf16.mxu1 %vm1152_vm2, %v4192_v34  ;;  %1734 = vmatprep.mubr.bf16.mxu1 %v3369_v19  ;;  %v3377_v19 = vld [vmem:[%s5023_s3 + $0x60] ss:$36 sps:$4 sm:$0xff]  }
 0x1f7   : > { %v4421_v33 = vpop.permute.xlu1 %1224 }
 0x1f9   : > { %1756 = vmatpush1.bf16.msra.mxu1 %v1158_v41 }
 0x1fa   : > { %v754_v50 = vpop.permute.xlu0 %753  ;;  %3102 = vmatprep.subr.msk.bf16.mxu1 %vm1152_vm2, %v4208_v14  ;;  %v1227_v14 = vsel %vm1226_vm3, %v4256_v2, %v4230_v18 }
 0x1fb   : > { %v811_v34 = vpop.permute.xlu1 %810 }
 0x1fc   : > { %1735 = vmatmul.mubr.bf16.gmra.mrb[12].mxu1 %v3371_v53 }
 0x1fd   : > { %1758 = vmatpush1.bf16.msra.mxu1 %v1159_v8  ;;  %1777 = vmatprep.mubr.bf16.mxu1 %v3374_v27 }
 0x1fe   : > { %v1223_v22 = vpop.permute.xlu0 %1222 }
 0x1ff   : > { %v1151_v17 = vpop.permute.xlu1 %1150  ;;  %v1234_v58 = vsel %vm1226_vm3, %v1223_v22, %v4421_v33 }
 0x200   : > { %3103 = vmatprep.subr.msk.bf16.mxu1 %vm1152_vm2, %v1151_v17  ;;  %v1160_v29 = vsel %vm1152_vm2, %v4222_v16, %v1151_v17  ;;  %v1228_v16 = vsel %vm1226_vm3, %v4281_v4, %v4260_v15 }
 0x201   : > { %1760 = vmatpush1.bf16.msra.mxu1 %v1160_v29 }
 0x202   : > { %v809_v30 = vpop.permute.xlu0 %808  ;;  %3104 = vmatprep.subr.msk.bf16.mxu1 %vm1226_vm3, %v4230_v18  ;;  %v1229_v18 = vsel %vm1226_vm3, %v4298_v44, %v4285_v45 }
 0x203   : > { %v1271_v13 = vpop.permute.xlu1 %1270  ;;  %v841_v56 = vsel %vm840_vm4, %v809_v30, %v811_v34 }
 0x205   : > { %1762 = vmatpush1.bf16.msra.mxu1 %v1227_v14 }
 0x206   : > { %v1269_v9 = vpop.permute.xlu0 %1268  ;;  %3105 = vmatprep.subr.msk.bf16.mxu1 %vm1226_vm3, %v4260_v15  ;;  %v1230_v15 = vsel %vm1226_vm3, %v4316_v32, %v4302_v47 }
 0x207   : > { %v815_v6 = vpop.permute.xlu1 %814  ;;  %v1301_v26 = vsel %vm1300_vm5, %v1269_v9, %v1271_v13 }
 0x209   : > { %1764 = vmatpush1.bf16.msra.mxu1 %v1228_v16 }
 0x20a   : > { %v813_v10 = vpop.permute.xlu0 %812  ;;  %3106 = vmatprep.subr.msk.bf16.mxu1 %vm1226_vm3, %v4285_v45  ;;  %v1231_v45 = vsel %vm1226_vm3, %v4349_v24, %v4335_v42 }
 0x20b   : > { %v1275_v20 = vpop.permute.xlu1 %1274 }
 0x20d   : > { %1766 = vmatpush1.bf16.msra.mxu1 %v1229_v18  ;;  %v3388_v18 = vld [vmem:[%s5023_s3 + $0x4c] ss:$36 sps:$4 sm:$0xff]  }
 0x20e   : > { %v1273_v2 = vpop.permute.xlu0 %1272  ;;  %3107 = vmatprep.subr.msk.bf16.mxu1 %vm1226_vm3, %v4302_v47  ;;  %v1232_v47 = vsel %vm1226_vm3, %v4384_v1, %v4370_v37  ;;  %v842_v1 = vsel %vm840_vm4, %v813_v10, %v815_v6 }
 0x20f   : > { %v819_v28 = vpop.permute.xlu1 %818  ;;  %v1302_v55 = vsel %vm1300_vm5, %v1273_v2, %v1275_v20 }
 0x211   : > { %1768 = vmatpush1.bf16.msra.mxu1 %v1230_v15  ;;  %v3387_v15 = vld [vmem:[%s5023_s3 + $0x20] ss:$36 sps:$4 sm:$0xff]  }
 0x212   : > { %v817_v4 = vpop.permute.xlu0 %816  ;;  %3108 = vmatprep.subr.msk.bf16.mxu1 %vm1226_vm3, %v4335_v42  ;;  %v1233_v42 = vsel %vm1226_vm3, %v1219_v49, %v4405_v38 }
 0x213   : > { %v1279_v43 = vpop.permute.xlu1 %1278  ;;  %v843_v52 = vsel %vm840_vm4, %v817_v4, %v819_v28 }
 0x215   : > { %1770 = vmatpush1.bf16.msra.mxu1 %v1231_v45  ;;  %v3391_v45 = vld [vmem:[%s5023_s3 + $0x68] ss:$36 sps:$4 sm:$0xff]  }
 0x216   : > { %v1277_v44 = vpop.permute.xlu0 %1276  ;;  %3109 = vmatprep.subr.msk.bf16.mxu1 %vm1226_vm3, %v4370_v37 }
 0x217   : > { %v823_v25 = vpop.permute.xlu1 %822  ;;  %v1303_v51 = vsel %vm1300_vm5, %v1277_v44, %v1279_v43  ;;  %v3394_v44 = vld [vmem:[%s5023_s3 + $0x90] ss:$36 sps:$4 sm:$0xff]  }
 0x219   : > { %1772 = vmatpush1.bf16.msra.mxu1 %v1232_v47  ;;  %v3395_v47 = vld [vmem:[%s5023_s3 + $0xb0] ss:$36 sps:$4 sm:$0xff]  }
 0x21a   : > { %v821_v32 = vpop.permute.xlu0 %820  ;;  %3110 = vmatprep.subr.msk.bf16.mxu1 %vm1226_vm3, %v4405_v38  ;;  %v3378_v38 = vld [vmem:[%s5023_s3 + $0xac] ss:$36 sps:$4 sm:$0xff]  }
 0x21b   : > { %v756_v48 = vpop.permute.xlu1 %755  ;;  %v844_v63 = vsel %vm840_vm4, %v821_v32, %v823_v25  ;;  %v3396_v25 = vld [vmem:[%s5023_s3 + $0xdc] ss:$36 sps:$4 sm:$0xff]  }
 0x21c   : > { %v765_v24 = vsel %vm757_vm0, %v754_v50, %v756_v48  ;;  %v3399_v48 = vld [vmem:[%s5023_s3 + $0xf8] ss:$36 sps:$4 sm:$0xff]  }
 0x21d   : > { %1540 = vmatprep.subr.bf16.mxu0 %v765_v24  ;;  %1774 = vmatpush1.bf16.msra.mxu1 %v1233_v42 }
 0x21e   : > { %v1281_v54 = vpop.permute.xlu0 %1280  ;;  %3039 = vmatpush1.bf16.msk.msra.mxu0 %vm4240_vm1, %v754_v50  ;;  %3111 = vmatprep.subr.msk.bf16.mxu1 %vm1226_vm3, %v4421_v33 }
 0x21f   : > { %1542 = vmatprep.subr.bf16.mxu0 %v841_v56  ;;  %v1283_v0 = vpop.permute.xlu1 %1282 }
 0x220   : > { %v1304_v53 = vsel %vm1300_vm5, %v1281_v54, %v1283_v0 }
 0x221   : > { %1776 = vmatpush1.bf16.msra.mxu1 %v1234_v58 }
 0x222   : > { %v825_v62 = vpop.permute.xlu0 %824  ;;  %3041 = vmatpush1.bf16.msk.msra.mxu0 %vm4487_vm8, %v809_v30  ;;  %3112 = vmatprep.subr.msk.bf16.mxu1 %vm1300_vm5, %v1271_v13  ;;  %v3383_v13 = vld [vmem:[%s5023_s3 + $0xf0] ss:$36 sps:$4 sm:$0xff]  }
 0x223   : > { %1544 = vmatprep.subr.bf16.mxu0 %v842_v1  ;;  %v827_v35 = vpop.permute.xlu1 %826 }
 0x224   : > { %1778 = vmatmul.mubr.bf16.vlgmr.msra.gmra.mrb[0].mxu1 %v3372_v59  ;;  %v845_v33 = vsel %vm840_vm4, %v825_v62, %v827_v35 }
 0x225   : > { %1819 = vmatpush1.bf16.msra.mxu1 %v1301_v26  ;;  %1787 = vmatprep.mubr.bf16.mxu1 %v3375_v60 }
 0x226   : > { %v1285_v5 = vpop.permute.xlu0 %1284  ;;  %3043 = vmatpush1.bf16.msk.msra.mxu0 %vm4487_vm8, %v813_v10  ;;  %3113 = vmatprep.subr.msk.bf16.mxu1 %vm1300_vm5, %v1275_v20  ;;  %v3384_v10 = vld [vmem:[%s5023_s3] ss:$36 sps:$4 sm:$0xff]  }
 0x227   : > { %1546 = vmatprep.subr.bf16.mxu0 %v843_v52  ;;  %v1287_v7 = vpop.permute.xlu1 %1286 }
 0x228   : > { %v1305_v8 = vsel %vm1300_vm5, %v1285_v5, %v1287_v7 }
 0x229   : > { %1821 = vmatpush1.bf16.msra.mxu1 %v1302_v55 }
 0x22a   : > { %v829_v11 = vpop.permute.xlu0 %828  ;;  %3045 = vmatpush1.bf16.msk.msra.mxu0 %vm4487_vm8, %v817_v4  ;;  %3114 = vmatprep.subr.msk.bf16.mxu1 %vm1300_vm5, %v1279_v43  ;;  %v3390_v4 = vld [vmem:[%s5023_s3 + $0x48] ss:$36 sps:$4 sm:$0xff]   ;;  %v3392_v43 = vld [vmem:[%s5023_s3 + $0x94] ss:$36 sps:$4 sm:$0xff]  }
 0x22b   : > { %1548 = vmatprep.subr.bf16.mxu0 %v844_v63  ;;  %v831_v31 = vpop.permute.xlu1 %830 }
 0x22c   : > { %1788 = vmatmul.mubr.bf16.gmra.mrb[4].mxu1 %v3377_v19  ;;  %v846_v50 = vsel %vm840_vm4, %v829_v11, %v831_v31 }
 0x22d   : > { %1823 = vmatpush1.bf16.msra.mxu1 %v1303_v51  ;;  %1797 = vmatprep.mubr.bf16.mxu1 %v3378_v38 }
 0x22e   : > { %v1289_v49 = vpop.permute.xlu0 %1288  ;;  %3047 = vmatpush1.bf16.msk.msra.mxu0 %vm4487_vm8, %v821_v32  ;;  %3115 = vmatprep.subr.msk.bf16.mxu1 %vm1300_vm5, %v1283_v0  ;;  %v3398_v32 = vld [vmem:[%s5023_s3 + $0xd8] ss:$36 sps:$4 sm:$0xff]  }
 0x22f   : > { %1550 = vmatprep.subr.bf16.mxu0 %v845_v33  ;;  %v1291_v41 = vpop.permute.xlu1 %1290 }
 0x230   : > { %v1306_v30 = vsel %vm1300_vm5, %v1289_v49, %v1291_v41 }
 0x231   : > { %1825 = vmatpush1.bf16.msra.mxu1 %v1304_v53 }
 0x232   : > { %v833_v27 = vpop.permute.xlu0 %832  ;;  %3049 = vmatpush1.bf16.msk.msra.mxu0 %vm4487_vm8, %v825_v62  ;;  %3116 = vmatprep.subr.msk.bf16.mxu1 %vm1300_vm5, %v1287_v7 }
 0x233   : > { %1552 = vmatprep.subr.bf16.mxu0 %v846_v50  ;;  %v835_v34 = vpop.permute.xlu1 %834 }
 0x234   : > { %1798 = vmatmul.mubr.bf16.gmra.mrb[8].mxu1 %v3380_v12  ;;  %v847_v17 = vsel %vm840_vm4, %v833_v27, %v835_v34 }
 0x235   : > { %1827 = vmatpush1.bf16.msra.mxu1 %v1305_v8  ;;  %1807 = vmatprep.mubr.bf16.mxu1 %v3381_v61 }
 0x236   : > { %v1293_v22 = vpop.permute.xlu0 %1292  ;;  %3051 = vmatpush1.bf16.msk.msra.mxu0 %vm4487_vm8, %v829_v11  ;;  %3117 = vmatprep.subr.msk.bf16.mxu1 %vm1300_vm5, %v1291_v41 }
 0x237   : > { %1554 = vmatprep.subr.bf16.mxu0 %v847_v17  ;;  %v1295_v29 = vpop.permute.xlu1 %1294 }
 0x238   : > { %v1307_v16 = vsel %vm1300_vm5, %v1293_v22, %v1295_v29 }
 0x239   : > { %1829 = vmatpush1.bf16.msra.mxu1 %v1306_v30 }
 0x23a   : > { %v837_v14 = vpop.permute.xlu0 %836  ;;  %3053 = vmatpush1.bf16.msk.msra.mxu0 %vm4487_vm8, %v833_v27  ;;  %3118 = vmatprep.subr.msk.bf16.mxu1 %vm1300_vm5, %v1295_v29 }
 0x23b   : > { %v839_v9 = vpop.permute.xlu1 %838 }
 0x23c   : > { %1808 = vmatmul.mubr.bf16.gmra.mrb[12].mxu1 %v3383_v13  ;;  %v848_v6 = vsel %vm840_vm4, %v837_v14, %v839_v9 }
 0x23d   : > { %1556 = vmatprep.subr.bf16.mxu0 %v848_v6  ;;  %1831 = vmatpush1.bf16.msra.mxu1 %v1307_v16 }
 0x23e   : > { %v1297_v20 = vpop.permute.xlu0 %1296  ;;  %3055 = vmatpush1.bf16.msk.msra.mxu0 %vm4487_vm8, %v837_v14  ;;  %1850 = vmatprep.mubr.bf16.mxu1 %v3436_v3 }
 0x23f   : > { %v1299_v2 = vpop.permute.xlu1 %1298 }
 0x240   : > { %v1308_v28 = vsel %vm1300_vm5, %v1297_v20, %v1299_v2  ;;  %3119 = vmatprep.subr.msk.bf16.mxu1 %vm1300_vm5, %v1299_v2 }
 0x241   : > { %1559 = vmatmul.mubr.bf16.vlgmr.msra.gmra.mrb[16].mxu0 %v3384_v10  ;;  %1833 = vmatpush1.bf16.msra.mxu1 %v1308_v28 }
 0x242   : > { %1568 = vmatprep.mubr.bf16.mxu0 %v3388_v18 }
 0x244   : > { %1851 = vmatmul.mubr.bf16.vlgmr.msra.gmra.mrb[0].mxu1 %v3387_v15 }
 0x245   : > { %1860 = vmatprep.mubr.bf16.mxu1 %v3436_v3 }
 0x249   : > { %1569 = vmatmul.mubr.bf16.gmra.mrb[20].mxu0 %v3390_v4 }
 0x24a   : > { %1578 = vmatprep.mubr.bf16.mxu0 %v3392_v43 }
 0x24c   : > { %1861 = vmatmul.mubr.bf16.gmra.mrb[4].mxu1 %v3391_v45 }
 0x24d   : > { %1870 = vmatprep.mubr.bf16.mxu1 %v3436_v3 }
 0x24f   : > { %v1902_v24 = vpop.permute.xlu0 %1901 }
 0x250   : > { %v1907_v42 = vpop.permute.xlu1 %1906 }
 0x251   : > { %1579 = vmatmul.mubr.bf16.gmra.mrb[24].mxu0 %v3394_v44 }
 0x252   : > { %1588 = vmatprep.mubr.bf16.mxu0 %v3396_v25 }
 0x254   : > { %1871 = vmatmul.mubr.bf16.gmra.mrb[8].mxu1 %v3395_v47  ;;  %v1966_v54 = vpop.permute.xlu1 %1965 }
 0x255   : > { %1880 = vmatprep.mubr.bf16.mxu1 %v3436_v3 }
 0x257   : > { %v1971_v56 = vpop.permute.xlu0 %1970 }
 0x258   : > { %v1912_v0 = vpop.permute.xlu1 %1911 }
 0x259   : > { %1589 = vmatmul.mubr.bf16.gmra.mrb[28].mxu0 %v3398_v32 }
 0x25b   : > { %v1917_v60 = vpop.permute.xlu0 %1916 }
 0x25c   : > { %1881 = vmatmul.mubr.bf16.gmra.mrb[12].mxu1 %v3399_v48  ;;  %v1976_v55 = vpop.permute.xlu1 %1975 }
 0x25d   : > { %2715 = vmatprep.mubr.bf16.mxu1 %v3436_v3 }
 0x25f   : > { %v1981_v51 = vpop.permute.xlu0 %1980 }
 0x260   : > { %v1922_v17 = vpop.permute.xlu1 %1921 }
 0x266   : > { %v1927_v20 = vpop.permute.xlu0 %1926 }
 0x314   : > { %v1560_v58 = vpop.f32.mrb[16].mxu0 }
 0x315   : > { %v1562_v59 = vpop.f32.mrb[17].mxu0 }
 0x316   : > { %v1564_v62 = vpop.f32.mrb[18].mxu0 }
 0x317   : > { %v1566_v1 = vpop.f32.mrb[19].mxu0  ;;  %v1852_v35 = vpop.f32.mrb[0].mxu1 }
 0x318   : > { %v3205_v26 = vadd.f32 %v1852_v35, %v1560_v58  ;;  %v1854_v5 = vpop.f32.mrb[1].mxu1  ;;  %v1991_v35 = vpop.permute.xlu0 %1990 }
 0x319   : > { %v3206_v52 = vadd.f32 %v1854_v5, %v1562_v59  ;;  %v1856_v7 = vpop.f32.mrb[2].mxu1 }
 0x31a   : > { %v1939_v19 = vmul.f32 %v3205_v26, %v1902_v24  ;;  %v3207_v38 = vadd.f32 %v1856_v7, %v1564_v62  ;;  %v1858_v11 = vpop.f32.mrb[3].mxu1 }
 0x31b   : > { %v1940_v63 = vmul.f32 %v3206_v52, %v1902_v24  ;;  %v3208_v31 = vadd.f32 %v1858_v11, %v1566_v1 }
 0x31c   : > { %v2003_v49 = vadd.f32 %v1966_v54, %v1939_v19  ;;  %v1941_v33 = vmul.f32 %v3207_v38, %v1907_v42  ;;  %v1570_v41 = vpop.f32.mrb[20].mxu0 }
 0x31d   : > { %v2004_v53 = vadd.f32 %v1966_v54, %v1940_v63  ;;  %v1942_v12 = vmul.f32 %v3208_v31, %v1907_v42  ;;  %v1572_v61 = vpop.f32.mrb[21].mxu0 }
 0x31e   : > { %v2005_v27 = vadd.f32 %v1971_v56, %v1941_v33  ;;  %v1574_v50 = vpop.f32.mrb[22].mxu0  ;;  %v2019_v29 = vmax.f32 %v2003_v49, 0.0 }
 0x31f   : > { %v2006_v34 = vadd.f32 %v1971_v56, %v1942_v12  ;;  %v1576_v8 = vpop.f32.mrb[23].mxu0  ;;  %v1862_v22 = vpop.f32.mrb[4].mxu1  ;;  %v2020_v9 = vmax.f32 %v2004_v53, 0.0 }
 0x320   : > { %v2021_v30 = vmax.f32 %v2005_v27, 0.0  ;;  %v3209_v13 = vadd.f32 %v1862_v22, %v1570_v41  ;;  %v1864_v14 = vpop.f32.mrb[5].mxu1  ;;  %v1986_v56 = vpop.permute.xlu1 %1985 }
 0x321   : > { %v2022_v6 = vmax.f32 %v2006_v34, 0.0  ;;  %v3210_v16 = vadd.f32 %v1864_v14, %v1572_v61  ;;  %v1866_v10 = vpop.f32.mrb[6].mxu1 }
 0x322   : > { %v4591_v18 = vpack.c.bf16 %v2021_v30, %v2019_v29  ;;  %v1943_v2 = vmul.f32 %v3209_v13, %v1912_v0  ;;  %v3211_v28 = vadd.f32 %v1866_v10, %v1574_v50  ;;  %v1868_v15 = vpop.f32.mrb[7].mxu1  ;;  %v1937_v29 = vpop.permute.xlu0 %1936 }
 0x323   : > { %v4593_v4 = vpack.c.bf16 %v2022_v6, %v2020_v9  ;;  %v1944_v43 = vmul.f32 %v3210_v16, %v1912_v0  ;;  %v3212_v45 = vadd.f32 %v1868_v15, %v1576_v8 }
 0x324   : > { %v2007_v44 = vadd.f32 %v1976_v55, %v1943_v2  ;;  %v1945_v25 = vmul.f32 %v3211_v28, %v1917_v60  ;;  %v1580_v47 = vpop.f32.mrb[24].mxu0  ;;  %v4598_v32 = vsel %vm691_vm9, %v4591_v18, 0  ;;  %v1932_v50 = vpop.permute.xlu1 %1931  ;;  %v2067_v39 = vsel %vm657_vm6, %v4591_v18, 0 }
 0x325   : > { %v2008_v48 = vadd.f32 %v1976_v55, %v1944_v43  ;;  %v1946_v42 = vmul.f32 %v3212_v45, %v1917_v60  ;;  %v1582_v24 = vpop.f32.mrb[25].mxu0  ;;  %2091 = vrot.lane.b32.xlu1 %v4598_v32, %s3441_s22  ;;  %v4605_v54 = vsel %vm692_vm10, %v4593_v4, 0  ;;  %v2068_v40 = vsel %vm658_vm7, %v4593_v4, 0 }
 0x326   : > { %v2009_v0 = vadd.f32 %v1981_v51, %v1945_v25  ;;  %v1584_v58 = vpop.f32.mrb[26].mxu0  ;;  %2093 = vrot.lane.b32.xlu0 %v4605_v54, %s3441_s22  ;;  %v2023_v60 = vmax.f32 %v2007_v44, 0.0 }
 0x327   : > { %v2010_v59 = vadd.f32 %v1981_v51, %v1946_v42  ;;  %v1586_v62 = vpop.f32.mrb[27].mxu0  ;;  %v1872_v1 = vpop.f32.mrb[8].mxu1  ;;  %v2024_v7 = vmax.f32 %v2008_v48, 0.0 }
 0x328   : > { %v2025_v26 = vmax.f32 %v2009_v0, 0.0  ;;  %v3213_v5 = vadd.f32 %v1872_v1, %v1580_v47  ;;  %v1874_v52 = vpop.f32.mrb[9].mxu1  ;;  %v1996_v42 = vpop.permute.xlu1 %1995 }
 0x329   : > { %v2026_v55 = vmax.f32 %v2010_v59, 0.0  ;;  %v3214_v19 = vadd.f32 %v1874_v52, %v1582_v24  ;;  %v1876_v38 = vpop.f32.mrb[10].mxu1  ;;  %v2001_v1 = vpop.permute.xlu0 %2000 }
 0x32a   : > { %v4609_v11 = vpack.c.bf16 %v2025_v26, %v2023_v60  ;;  %v1947_v63 = vmul.f32 %v3213_v5, %v1922_v17  ;;  %v3215_v31 = vadd.f32 %v1876_v38, %v1584_v58  ;;  %v1878_v49 = vpop.f32.mrb[11].mxu1 }
 0x32b   : > { %v4611_v33 = vpack.c.bf16 %v2026_v55, %v2024_v7  ;;  %v1948_v41 = vmul.f32 %v3214_v19, %v1922_v17  ;;  %v3216_v51 = vadd.f32 %v1878_v49, %v1586_v62 }
 0x32c   : > { %v2011_v53 = vadd.f32 %v1986_v56, %v1947_v63  ;;  %v1949_v12 = vmul.f32 %v3215_v31, %v1927_v20  ;;  %v1590_v61 = vpop.f32.mrb[28].mxu0  ;;  %v4616_v27 = vsel %vm691_vm9, %v4609_v11, 0 }
 0x32d   : > { %v2012_v34 = vadd.f32 %v1986_v56, %v1948_v41  ;;  %v1950_v8 = vmul.f32 %v3216_v51, %v1927_v20  ;;  %v1592_v22 = vpop.f32.mrb[29].mxu0  ;;  %2095 = vrot.lane.b32.xlu1 %v4616_v27, %s3441_s22  ;;  %v4623_v17 = vsel %vm692_vm10, %v4611_v33, 0  ;;  %v2069_v51 = vsel %vm657_vm6, %v4609_v11, 0 }
 0x32e   : > { %v2013_v30 = vadd.f32 %v1991_v35, %v1949_v12  ;;  %v1594_v13 = vpop.f32.mrb[30].mxu0  ;;  %2097 = vrot.lane.b32.xlu0 %v4623_v17, %s3441_s22  ;;  %v2027_v16 = vmax.f32 %v2011_v53, 0.0  ;;  %v2070_v53 = vsel %vm658_vm7, %v4611_v33, 0 }
 0x32f   : > { %v2014_v14 = vadd.f32 %v1991_v35, %v1950_v8  ;;  %v1596_v9 = vpop.f32.mrb[31].mxu0  ;;  %v1882_v6 = vpop.f32.mrb[12].mxu1  ;;  %v2028_v28 = vmax.f32 %v2012_v34, 0.0  ;;  %v3402_v8 = vld [vmem:[%s5026_s6 + $0x4] ss:$20 sps:$4 sm:$0xff]  }
 0x330   : > { %v2029_v10 = vmax.f32 %v2013_v30, 0.0  ;;  %v3217_v20 = vadd.f32 %v1882_v6, %v1590_v61  ;;  %v1884_v2 = vpop.f32.mrb[13].mxu1  ;;  %2539 = vmatprep.mubr.bf16.mxu0 %v3402_v8 }
 0x331   : > { %v2030_v15 = vmax.f32 %v2014_v14, 0.0  ;;  %v3218_v43 = vadd.f32 %v1884_v2, %v1592_v22  ;;  %v1886_v45 = vpop.f32.mrb[14].mxu1  ;;  %v2729_v2 = vld [vmem:[%s5027_s7 + $0x18] sm:$0xff] }
 0x332   : > { %v4627_v44 = vpack.c.bf16 %v2029_v10, %v2027_v16  ;;  %v1951_v25 = vmul.f32 %v3217_v20, %v1932_v50  ;;  %v3219_v47 = vadd.f32 %v1886_v45, %v1594_v13  ;;  %v1888_v48 = vpop.f32.mrb[15].mxu1  ;;  %v2726_v13 = vld [vmem:[%s5027_s7] sm:$0xff]  ;;  %v2728_v10 = vld [vmem:[%s5027_s7 + $0x10] sm:$0xff]  ;;  %v2731_v45 = vld [vmem:[%s5027_s7 + $0x28] sm:$0xff] }
 0x333   : > { %v4629_v24 = vpack.c.bf16 %v2030_v15, %v2028_v28  ;;  %v1952_v56 = vmul.f32 %v3218_v43, %v1932_v50  ;;  %v3220_v0 = vadd.f32 %v1888_v48, %v1596_v9  ;;  %v2727_v9 = vld [vmem:[%s5027_s7 + $0x8] sm:$0xff]  ;;  %v2730_v43 = vld [vmem:[%s5027_s7 + $0x20] sm:$0xff]  ;;  %v2732_v48 = vld [vmem:[%s5027_s7 + $0x30] sm:$0xff] }
 0x334   : > { %v2015_v58 = vadd.f32 %v1996_v42, %v1951_v25  ;;  %v1953_v59 = vmul.f32 %v3219_v47, %v1937_v29  ;;  %v4634_v62 = vsel %vm691_vm9, %v4627_v44, 0  ;;  %v2071_v12 = vsel %vm657_vm6, %v4627_v44, 0 }
 0x335   : > { %v2016_v35 = vadd.f32 %v1996_v42, %v1952_v56  ;;  %v1954_v60 = vmul.f32 %v3220_v0, %v1937_v29  ;;  %2099 = vrot.lane.b32.xlu1 %v4634_v62, %s3441_s22  ;;  %v2080_v26 = vsel %vm692_vm10, %v4629_v24, 0  ;;  %v2072_v61 = vsel %vm658_vm7, %v4629_v24, 0  ;;  %v2733_v56 = vld [vmem:[%s5027_s7 + $0x38] sm:$0xff] }
 0x336   : > { %v2017_v5 = vadd.f32 %v2001_v1, %v1953_v59  ;;  %2101 = vrot.lane.b32.xlu0 %v2080_v26, %s3441_s22  ;;  %v2031_v7 = vmax.f32 %v2015_v58, 0.0  ;;  %v2790_v59 = vld [vmem:[%s5028_s8] sm:$0xff] }
 0x337   : > { %v2018_v52 = vadd.f32 %v2001_v1, %v1954_v60  ;;  %v2032_v19 = vmax.f32 %v2016_v35, 0.0  ;;  %v2791_v1 = vld [vmem:[%s5028_s8 + $0x8] sm:$0xff] }
 0x338   : > { %v2033_v55 = vmax.f32 %v2017_v5, 0.0 }
 0x339   : > { %v2034_v38 = vmax.f32 %v2018_v52, 0.0  ;;  %v2793_v52 = vld [vmem:[%s5028_s8 + $0x18] sm:$0xff] }
 0x33a   : > { %v4642_v63 = vpack.c.bf16 %v2033_v55, %v2031_v7 }
 0x33b   : > { %v4644_v31 = vpack.c.bf16 %v2034_v38, %v2032_v19  ;;  %v2794_v19 = vld [vmem:[%s5028_s8 + $0x20] sm:$0xff]  ;;  %v2795_v38 = vld [vmem:[%s5028_s8 + $0x28] sm:$0xff] }
 0x33c   : > { %v2081_v49 = vsel %vm691_vm9, %v4642_v63, 0  ;;  %v2073_v50 = vsel %vm657_vm6, %v4642_v63, 0  ;;  %vm5043_vm6 = vcmask 523264  }
 0x33d   : > { %2103 = vrot.lane.b32.xlu1 %v2081_v49, %s3441_s22  ;;  %v2082_v41 = vsel %vm692_vm10, %v4644_v31, 0  ;;  %v2074_v34 = vsel %vm658_vm7, %v4644_v31, 0 }
 0x33e   : > { %2105 = vrot.lane.b32.xlu0 %v2082_v41, %s3441_s22 }
 0x341   : > { %2135 = vrot.lane.b32.xlu1 %v4591_v18, %s3443_s24 }
 0x342   : > { %2137 = vrot.lane.b32.xlu0 %v4593_v4, %s3443_s24 }
 0x345   : > { %2139 = vrot.lane.b32.xlu1 %v4609_v11, %s3443_s24 }
 0x346   : > { %2141 = vrot.lane.b32.xlu0 %v4611_v33, %s3443_s24 }
 0x349   : > { %2143 = vrot.lane.b32.xlu1 %v4627_v44, %s3443_s24 }
 0x34a   : > { %2145 = vrot.lane.b32.xlu0 %v4629_v24, %s3443_s24 }
 0x34d   : > { %2147 = vrot.lane.b32.xlu1 %v4642_v63, %s3443_s24 }
 0x34e   : > { %2149 = vrot.lane.b32.xlu0 %v4644_v31, %s3443_s24 }
 0x351   : > { %2179 = vrot.lane.b32.xlu1 %v2067_v39, %s3437_s16 }
 0x352   : > { %2181 = vrot.lane.b32.xlu0 %v2068_v40, %s3437_s16 }
 0x355   : > { %2183 = vrot.lane.b32.xlu1 %v2069_v51, %s3437_s16 }
 0x356   : > { %2185 = vrot.lane.b32.xlu0 %v2070_v53, %s3437_s16 }
 0x359   : > { %2187 = vrot.lane.b32.xlu1 %v2071_v12, %s3437_s16 }
 0x35a   : > { %2189 = vrot.lane.b32.xlu0 %v2072_v61, %s3437_s16 }
 0x35d   : > { %2191 = vrot.lane.b32.xlu1 %v2073_v50, %s3437_s16 }
 0x35e   : > { %2193 = vrot.lane.b32.xlu0 %v2074_v34, %s3437_s16 }
 0x361   : > { %2215 = vrot.lane.b32.xlu1 %v4598_v32, %s3438_s17 }
 0x362   : > { %2217 = vrot.lane.b32.xlu0 %v4605_v54, %s3438_s17 }
 0x365   : > { %2219 = vrot.lane.b32.xlu1 %v4616_v27, %s3438_s17 }
 0x366   : > { %2221 = vrot.lane.b32.xlu0 %v4623_v17, %s3438_s17 }
 0x369   : > { %2223 = vrot.lane.b32.xlu1 %v4634_v62, %s3438_s17 }
 0x36a   : > { %2225 = vrot.lane.b32.xlu0 %v2080_v26, %s3438_s17 }
 0x36d   : > { %2227 = vrot.lane.b32.xlu1 %v2081_v49, %s3438_s17 }
 0x36e   : > { %2229 = vrot.lane.b32.xlu0 %v2082_v41, %s3438_s17 }
 0x371   : > { %2251 = vrot.lane.b32.xlu1 %v2067_v39, %s3439_s18 }
 0x372   : > { %2253 = vrot.lane.b32.xlu0 %v2068_v40, %s3439_s18 }
 0x375   : > { %2255 = vrot.lane.b32.xlu1 %v2069_v51, %s3439_s18 }
 0x376   : > { %2257 = vrot.lane.b32.xlu0 %v2070_v53, %s3439_s18 }
 0x379   : > { %2259 = vrot.lane.b32.xlu1 %v2071_v12, %s3439_s18 }
 0x37a   : > { %2261 = vrot.lane.b32.xlu0 %v2072_v61, %s3439_s18 }
 0x37d   : > { %2263 = vrot.lane.b32.xlu1 %v2073_v50, %s3439_s18 }
 0x37e   : > { %2265 = vrot.lane.b32.xlu0 %v2074_v34, %s3439_s18 }
 0x381   : > { %2287 = vrot.lane.b32.xlu1 %v4598_v32, %s3440_s21 }
 0x382   : > { %2289 = vrot.lane.b32.xlu0 %v4605_v54, %s3440_s21 }
 0x385   : > { %2291 = vrot.lane.b32.xlu1 %v4616_v27, %s3440_s21 }
 0x386   : > { %2293 = vrot.lane.b32.xlu0 %v4623_v17, %s3440_s21 }
 0x389   : > { %2295 = vrot.lane.b32.xlu1 %v4634_v62, %s3440_s21 }
 0x38a   : > { %2297 = vrot.lane.b32.xlu0 %v2080_v26, %s3440_s21  ;;  %v2792_v26 = vld [vmem:[%s5028_s8 + $0x10] sm:$0xff] }
 0x38d   : > { %2299 = vrot.lane.b32.xlu1 %v2081_v49, %s3440_s21 }
 0x38e   : > { %2301 = vrot.lane.b32.xlu0 %v2082_v41, %s3440_s21 }
 0x391   : > { %2323 = vrot.lane.b32.xlu1 %v4591_v18, %s3442_s23 }
 0x392   : > { %2325 = vrot.lane.b32.xlu0 %v4593_v4, %s3442_s23 }
 0x395   : > { %2327 = vrot.lane.b32.xlu1 %v4609_v11, %s3442_s23 }
 0x396   : > { %2329 = vrot.lane.b32.xlu0 %v4611_v33, %s3442_s23 }
 0x397   : > { %v2092_v21 = vpop.permute.xlu1 %2091 }
 0x398   : > { %v2094_v23 = vpop.permute.xlu0 %2093 }
 0x399   : > { %2331 = vrot.lane.b32.xlu1 %v4627_v44, %s3442_s23  ;;  %v2107_v32 = vsel %vm757_vm0, %v2092_v21, %v2094_v23 }
 0x39a   : > { %2333 = vrot.lane.b32.xlu0 %v4629_v24, %s3442_s23  ;;  %2507 = vmatprep.subr.bf16.mxu0 %v2107_v32 }
 0x39b   : > { %3141 = vmatpush1.bf16.msk.msra.mxu0 %vm4240_vm1, %v2092_v21 }
 0x39d   : > { %2335 = vrot.lane.b32.xlu1 %v4642_v63, %s3442_s23 }
 0x39e   : > { %2337 = vrot.lane.b32.xlu0 %v4644_v31, %s3442_s23 }
 0x39f   : > { %v2096_v54 = vpop.permute.xlu1 %2095 }
 0x3a0   : > { %v2098_v27 = vpop.permute.xlu0 %2097 }
 0x3a1   : > { %2359 = vrot.lane.b32.xlu1 %v2067_v39, %s3444_s25  ;;  %v2108_v22 = vsel %vm757_vm0, %v2096_v54, %v2098_v27  ;;  %v2796_v39 = vld [vmem:[%s5028_s8 + $0x30] sm:$0xff] }
 0x3a2   : > { %2361 = vrot.lane.b32.xlu0 %v2068_v40, %s3444_s25  ;;  %2509 = vmatprep.subr.bf16.mxu0 %v2108_v22 }
 0x3a3   : > { %3143 = vmatpush1.bf16.msk.msra.mxu0 %vm4240_vm1, %v2096_v54 }
 0x3a5   : > { %2363 = vrot.lane.b32.xlu1 %v2069_v51, %s3444_s25  ;;  %v2797_v51 = vld [vmem:[%s5028_s8 + $0x38] sm:$0xff] }
 0x3a6   : > { %2365 = vrot.lane.b32.xlu0 %v2070_v53, %s3444_s25 }
 0x3a7   : > { %v2100_v17 = vpop.permute.xlu1 %2099 }
 0x3a8   : > { %v2102_v29 = vpop.permute.xlu0 %2101 }
 0x3a9   : > { %2367 = vrot.lane.b32.xlu1 %v2071_v12, %s3444_s25  ;;  %v2109_v30 = vsel %vm757_vm0, %v2100_v17, %v2102_v29 }
 0x3aa   : > { %2369 = vrot.lane.b32.xlu0 %v2072_v61, %s3444_s25  ;;  %2511 = vmatprep.subr.bf16.mxu0 %v2109_v30 }
 0x3ab   : > { %3145 = vmatpush1.bf16.msk.msra.mxu0 %vm4240_vm1, %v2100_v17 }
 0x3ad   : > { %2371 = vrot.lane.b32.xlu1 %v2073_v50, %s3444_s25 }
 0x3ae   : > { %2373 = vrot.lane.b32.xlu0 %v2074_v34, %s3444_s25 }
 0x3af   : > { %v2104_v14 = vpop.permute.xlu1 %2103 }
 0x3b0   : > { %v2106_v6 = vpop.permute.xlu0 %2105 }
 0x3b1   : > { %2736 = vperm.xlu1 %3319, %v2726_v13   ;;  %v2110_v16 = vsel %vm757_vm0, %v2104_v14, %v2106_v6  ;;  %v3403_v6 = vld [vmem:[%s5026_s6 + $0x2c] ss:$20 sps:$4 sm:$0xff]  }
 0x3b2   : > { %2741 = vperm.xlu0 %3318, %v2727_v9   ;;  %2513 = vmatprep.subr.bf16.mxu0 %v2110_v16 }
 0x3b3   : > { %3147 = vmatpush1.bf16.msk.msra.mxu0 %vm4240_vm1, %v2104_v14  ;;  %v2136_v20 = vpop.permute.xlu1 %2135  ;;  %v3400_v14 = vld [vmem:[%s5026_s6] ss:$20 sps:$4 sm:$0xff]  }
 0x3b4   : > { %v2138_v28 = vpop.permute.xlu0 %2137 }
 0x3b5   : > { %2746 = vperm.xlu1 %3319, %v2728_v10   ;;  %v2151_v15 = vsel %vm840_vm4, %v2136_v20, %v2138_v28  ;;  %v3406_v28 = vld [vmem:[%s5026_s6 + $0x54] ss:$20 sps:$4 sm:$0xff]  }
 0x3b6   : > { %2751 = vperm.xlu0 %3318, %v2729_v2   ;;  %2515 = vmatprep.subr.bf16.mxu0 %v2151_v15 }
 0x3b7   : > { %3149 = vmatpush1.bf16.msk.msra.mxu0 %vm4487_vm8, %v2136_v20  ;;  %v2140_v36 = vpop.permute.xlu1 %2139 }
 0x3b8   : > { %v2142_v25 = vpop.permute.xlu0 %2141 }
 0x3b9   : > { %2756 = vperm.xlu1 %3319, %v2730_v43   ;;  %v2152_v47 = vsel %vm840_vm4, %v2140_v36, %v2142_v25  ;;  %v3409_v43 = vld [vmem:[%s5026_s6 + $0x7c] ss:$20 sps:$4 sm:$0xff]  }
 0x3ba   : > { %2761 = vperm.xlu0 %3318, %v2731_v45   ;;  %2517 = vmatprep.subr.bf16.mxu0 %v2152_v47  ;;  %v3414_v47 = vld [vmem:[%s5026_s6 + $0xc] ss:$20 sps:$4 sm:$0xff]  }
 0x3bb   : > { %3151 = vmatpush1.bf16.msk.msra.mxu0 %vm4487_vm8, %v2140_v36  ;;  %v2144_v42 = vpop.permute.xlu1 %2143 }
 0x3bc   : > { %v2146_v0 = vpop.permute.xlu0 %2145 }
 0x3bd   : > { %2766 = vperm.xlu1 %3319, %v2732_v48   ;;  %v2153_v58 = vsel %vm840_vm4, %v2144_v42, %v2146_v0 }
 0x3be   : > { %2771 = vperm.xlu0 %3318, %v2733_v56   ;;  %2519 = vmatprep.subr.bf16.mxu0 %v2153_v58 }
 0x3bf   : > { %3153 = vmatpush1.bf16.msk.msra.mxu0 %vm4487_vm8, %v2144_v42  ;;  %v2148_v62 = vpop.permute.xlu1 %2147 }
 0x3c0   : > { %v2150_v35 = vpop.permute.xlu0 %2149 }
 0x3c1   : > { %2800 = vperm.xlu1 %3319, %v2790_v59   ;;  %v2154_v60 = vsel %vm840_vm4, %v2148_v62, %v2150_v35 }
 0x3c2   : > { %2805 = vperm.xlu0 %3318, %v2791_v1   ;;  %2521 = vmatprep.subr.bf16.mxu0 %v2154_v60 }
 0x3c3   : > { %3155 = vmatpush1.bf16.msk.msra.mxu0 %vm4487_vm8, %v2148_v62  ;;  %v2180_v5 = vpop.permute.xlu1 %2179 }
 0x3c4   : > { %v2182_v7 = vpop.permute.xlu0 %2181 }
 0x3c5   : > { %2810 = vperm.xlu1 %3319, %v2792_v26   ;;  %v2195_v55 = vsel %vm930_vm11, %v2180_v5, %v2182_v7 }
 0x3c6   : > { %2815 = vperm.xlu0 %3318, %v2793_v52   ;;  %2523 = vmatprep.subr.bf16.mxu0 %v2195_v55 }
 0x3c7   : > { %3157 = vmatpush1.bf16.msk.msra.mxu0 %vm3719_vm12, %v2180_v5  ;;  %v2184_v37 = vpop.permute.xlu1 %2183 }
 0x3c8   : > { %v2186_v49 = vpop.permute.xlu0 %2185 }
 0x3c9   : > { %2820 = vperm.xlu1 %3319, %v2794_v19   ;;  %v2196_v41 = vsel %vm930_vm11, %v2184_v37, %v2186_v49 }
 0x3ca   : > { %2825 = vperm.xlu0 %3318, %v2795_v38   ;;  %2525 = vmatprep.subr.bf16.mxu0 %v2196_v41 }
 0x3cb   : > { %3159 = vmatpush1.bf16.msk.msra.mxu0 %vm3719_vm12, %v2184_v37  ;;  %v2188_v40 = vpop.permute.xlu1 %2187 }
 0x3cc   : > { %v2190_v53 = vpop.permute.xlu0 %2189 }
 0x3cd   : > { %2830 = vperm.xlu1 %3319, %v2796_v39   ;;  %v2197_v12 = vsel %vm930_vm11, %v2188_v40, %v2190_v53 }
 0x3ce   : > { %2835 = vperm.xlu0 %3318, %v2797_v51   ;;  %2527 = vmatprep.subr.bf16.mxu0 %v2197_v12 }
 0x3cf   : > { %3161 = vmatpush1.bf16.msk.msra.mxu0 %vm3719_vm12, %v2188_v40  ;;  %v2192_v61 = vpop.permute.xlu1 %2191 }
 0x3d0   : > { %v2194_v50 = vpop.permute.xlu0 %2193 }
 0x3d1   : > { %v2198_v34 = vsel %vm930_vm11, %v2192_v61, %v2194_v50 }
 0x3d2   : > { %2529 = vmatprep.subr.bf16.mxu0 %v2198_v34 }
 0x3d3   : > { %3163 = vmatpush1.bf16.msk.msra.mxu0 %vm3719_vm12, %v2192_v61  ;;  %v2216_v8 = vpop.permute.xlu1 %2215 }
 0x3d4   : > { %v2218_v21 = vpop.permute.xlu0 %2217 }
 0x3d5   : > { %v2231_v23 = vsel %vm1004_vm13, %v2216_v8, %v2218_v21 }
 0x3d6   : > { %2531 = vmatprep.subr.bf16.mxu0 %v2231_v23 }
 0x3d7   : > { %3165 = vmatpush1.bf16.msk.msra.mxu0 %vm4021_vm14, %v2216_v8  ;;  %v2220_v32 = vpop.permute.xlu1 %2219 }
 0x3d8   : > { %v2222_v54 = vpop.permute.xlu0 %2221 }
 0x3d9   : > { %v2232_v27 = vsel %vm1004_vm13, %v2220_v32, %v2222_v54  ;;  %v3424_v54 = vld [vmem:[%s5026_s6 + $0x88] ss:$20 sps:$4 sm:$0xff]  }
 0x3da   : > { %2533 = vmatprep.subr.bf16.mxu0 %v2232_v27 }
 0x3db   : > { %3167 = vmatpush1.bf16.msk.msra.mxu0 %vm4021_vm14, %v2220_v32  ;;  %v2224_v22 = vpop.permute.xlu1 %2223 }
 0x3dc   : > { %v2226_v17 = vpop.permute.xlu0 %2225 }
 0x3dd   : > { %v2233_v57 = vsel %vm1004_vm13, %v2224_v22, %v2226_v17  ;;  %v3415_v17 = vld [vmem:[%s5026_s6 + $0x34] ss:$20 sps:$4 sm:$0xff]  }
 0x3de   : > { %2535 = vmatprep.subr.bf16.mxu0 %v2233_v57  ;;  %v3417_v57 = vld [vmem:[%s5026_s6 + $0x30] ss:$20 sps:$4 sm:$0xff]  }
 0x3df   : > { %3169 = vmatpush1.bf16.msk.msra.mxu0 %vm4021_vm14, %v2224_v22  ;;  %v2228_v29 = vpop.permute.xlu1 %2227  ;;  %v3412_v22 = vld [vmem:[%s5026_s6 + $0x8] ss:$20 sps:$4 sm:$0xff]  }
 0x3e0   : > { %v2230_v30 = vpop.permute.xlu0 %2229 }
 0x3e1   : > { %v2234_v13 = vsel %vm1004_vm13, %v2228_v29, %v2230_v30  ;;  %v3420_v30 = vld [vmem:[%s5026_s6 + $0x58] ss:$20 sps:$4 sm:$0xff]  }
 0x3e2   : > { %2537 = vmatprep.subr.bf16.mxu0 %v2234_v13  ;;  %v3421_v13 = vld [vmem:[%s5026_s6 + $0x84] ss:$20 sps:$4 sm:$0xff]  }
 0x3e3   : > { %3171 = vmatpush1.bf16.msk.msra.mxu0 %vm4021_vm14, %v2228_v29  ;;  %v2252_v9 = vpop.permute.xlu1 %2251  ;;  %v3418_v29 = vld [vmem:[%s5026_s6 + $0x5c] ss:$20 sps:$4 sm:$0xff]  }
 0x3e4   : > { %v2254_v16 = vpop.permute.xlu0 %2253  ;;  %2580 = vmatprep.subr.bf16.mxu0 %v4593_v4 }
 0x3e6   : > { %2540 = vmatmul.mubr.bf16.vlgmr.msra.gmra.mrb[32].mxu0 %v3400_v14  ;;  %v3423_v14 = vld [vmem:[%s5026_s6 + $0x80] ss:$20 sps:$4 sm:$0xff]  }
 0x3e7   : > { %2581 = vmatpush1.bf16.msra.mxu0 %v4591_v18  ;;  %v2256_v10 = vpop.permute.xlu1 %2255  ;;  %2549 = vmatprep.mubr.bf16.mxu0 %v3403_v6  ;;  %v3426_v6 = vld [vmem:[%s5026_s6 + $0x38] ss:$20 sps:$4 sm:$0xff]  }
 0x3e8   : > { %v2258_v20 = vpop.permute.xlu0 %2257  ;;  %2582 = vmatprep.subr.bf16.mxu0 %v4611_v33 }
 0x3e9   : > { %v2268_v45 = vsel %vm1078_vm15, %v2256_v10, %v2258_v20 }
 0x3eb   : > { %2583 = vmatpush1.bf16.msra.mxu0 %v4609_v11  ;;  %v2260_v2 = vpop.permute.xlu1 %2259  ;;  %v3408_v11 = vld [vmem:[%s5026_s6 + $0x50] ss:$20 sps:$4 sm:$0xff]  }
 0x3ec   : > { %v2262_v4 = vpop.permute.xlu0 %2261  ;;  %2584 = vmatprep.subr.bf16.mxu0 %v4629_v24 }
 0x3ed   : > { %v2269_v42 = vsel %vm1078_vm15, %v2260_v2, %v2262_v4 }
 0x3ee   : > { %2550 = vmatmul.mubr.bf16.gmra.mrb[36].mxu0 %v3405_v46 }
 0x3ef   : > { %2585 = vmatpush1.bf16.msra.mxu0 %v4627_v44  ;;  %v2264_v18 = vpop.permute.xlu1 %2263  ;;  %2559 = vmatprep.mubr.bf16.mxu0 %v3406_v28  ;;  %v2267_v44 = vsel %vm1078_vm15, %v2252_v9, %v2254_v16  ;;  %v3425_v9 = vld [vmem:[%s5026_s6 + $0x10] ss:$20 sps:$4 sm:$0xff]  }
 0x3f0   : > { %v2266_v33 = vpop.permute.xlu0 %2265  ;;  %2586 = vmatprep.subr.bf16.mxu0 %v4644_v31 }
 0x3f1   : > { %v2270_v58 = vsel %vm1078_vm15, %v2264_v18, %v2266_v33 }
 0x3f3   : > { %2587 = vmatpush1.bf16.msra.mxu0 %v4642_v63  ;;  %v2288_v15 = vpop.permute.xlu1 %2287  ;;  %v3411_v63 = vld [vmem:[%s5026_s6 + $0x78] ss:$20 sps:$4 sm:$0xff]  }
 0x3f4   : > { %v2290_v24 = vpop.permute.xlu0 %2289  ;;  %3172 = vmatprep.subr.msk.bf16.mxu0 %vm1078_vm15, %v2254_v16  ;;  %v3427_v16 = vld [vmem:[%s5026_s6 + $0x60] ss:$20 sps:$4 sm:$0xff]  }
 0x3f5   : > { %v2303_v1 = vsel %vm1152_vm2, %v2288_v15, %v2290_v24 }
 0x3f6   : > { %2560 = vmatmul.mubr.bf16.gmra.mrb[40].mxu0 %v3408_v11 }
 0x3f7   : > { %2589 = vmatpush1.bf16.msra.mxu0 %v2267_v44  ;;  %v2292_v36 = vpop.permute.xlu1 %2291  ;;  %2569 = vmatprep.mubr.bf16.mxu0 %v3409_v43 }
 0x3f8   : > { %v2294_v31 = vpop.permute.xlu0 %2293  ;;  %3173 = vmatprep.subr.msk.bf16.mxu0 %vm1078_vm15, %v2258_v20 }
 0x3f9   : > { %v2304_v26 = vsel %vm1152_vm2, %v2292_v36, %v2294_v31 }
 0x3fb   : > { %2591 = vmatpush1.bf16.msra.mxu0 %v2268_v45  ;;  %v2296_v25 = vpop.permute.xlu1 %2295 }
 0x3fc   : > { %v2298_v48 = vpop.permute.xlu0 %2297  ;;  %3174 = vmatprep.subr.msk.bf16.mxu0 %vm1078_vm15, %v2262_v4 }
 0x3fd   : > { %v2305_v7 = vsel %vm1152_vm2, %v2296_v25, %v2298_v48 }
 0x3fe   : > { %2570 = vmatmul.mubr.bf16.gmra.mrb[44].mxu0 %v3411_v63 }
 0x3ff   : > { %2593 = vmatpush1.bf16.msra.mxu0 %v2269_v42  ;;  %v2300_v56 = vpop.permute.xlu1 %2299  ;;  %2612 = vmatprep.mubr.bf16.mxu0 %v3414_v47 }
 0x400   : > { %v2302_v0 = vpop.permute.xlu0 %2301  ;;  %3175 = vmatprep.subr.msk.bf16.mxu0 %vm1078_vm15, %v2266_v33 }
 0x401   : > { %v2306_v37 = vsel %vm1152_vm2, %v2300_v56, %v2302_v0 }
 0x403   : > { %2595 = vmatpush1.bf16.msra.mxu0 %v2270_v58  ;;  %v2324_v59 = vpop.permute.xlu1 %2323 }
 0x404   : > { %v2326_v62 = vpop.permute.xlu0 %2325  ;;  %3176 = vmatprep.subr.msk.bf16.mxu0 %vm1152_vm2, %v2290_v24 }
 0x405   : > { %v2339_v39 = vsel %vm1226_vm3, %v2324_v59, %v2326_v62 }
 0x407   : > { %2597 = vmatpush1.bf16.msra.mxu0 %v2303_v1  ;;  %v2328_v35 = vpop.permute.xlu1 %2327 }
 0x408   : > { %v2330_v60 = vpop.permute.xlu0 %2329  ;;  %3177 = vmatprep.subr.msk.bf16.mxu0 %vm1152_vm2, %v2294_v31 }
 0x409   : > { %v2340_v12 = vsel %vm1226_vm3, %v2328_v35, %v2330_v60 }
 0x40b   : > { %2599 = vmatpush1.bf16.msra.mxu0 %v2304_v26  ;;  %v2332_v5 = vpop.permute.xlu1 %2331 }
 0x40c   : > { %v2334_v52 = vpop.permute.xlu0 %2333  ;;  %3178 = vmatprep.subr.msk.bf16.mxu0 %vm1152_vm2, %v2298_v48 }
 0x40d   : > { %v2341_v8 = vsel %vm1226_vm3, %v2332_v5, %v2334_v52 }
 0x40f   : > { %2601 = vmatpush1.bf16.msra.mxu0 %v2305_v7  ;;  %v2336_v55 = vpop.permute.xlu1 %2335 }
 0x410   : > { %v2338_v19 = vpop.permute.xlu0 %2337  ;;  %3179 = vmatprep.subr.msk.bf16.mxu0 %vm1152_vm2, %v2302_v0 }
 0x411   : > { %v2342_v27 = vsel %vm1226_vm3, %v2336_v55, %v2338_v19 }
 0x413   : > { %2603 = vmatpush1.bf16.msra.mxu0 %v2306_v37  ;;  %v2360_v38 = vpop.permute.xlu1 %2359 }
 0x414   : > { %v2362_v49 = vpop.permute.xlu0 %2361  ;;  %3180 = vmatprep.subr.msk.bf16.mxu0 %vm1226_vm3, %v2326_v62 }
 0x415   : > { %3197 = vmatprep.subr.msk.bf16.mxu1 %vm1300_vm5, %v2362_v49  ;;  %v2375_v41 = vsel %vm1300_vm5, %v2360_v38, %v2362_v49 }
 0x416   : > { %3201 = vmatpush1.bf16.msra.mxu1 %v2375_v41 }
 0x417   : > { %2605 = vmatpush1.bf16.msra.mxu0 %v2339_v39  ;;  %v2364_v40 = vpop.permute.xlu1 %2363 }
 0x418   : > { %v2366_v51 = vpop.permute.xlu0 %2365  ;;  %3181 = vmatprep.subr.msk.bf16.mxu0 %vm1226_vm3, %v2330_v60 }
 0x419   : > { %3198 = vmatprep.subr.msk.bf16.mxu1 %vm1300_vm5, %v2366_v51  ;;  %v2376_v53 = vsel %vm1300_vm5, %v2364_v40, %v2366_v51 }
 0x41a   : > { %3202 = vmatpush1.bf16.msra.mxu1 %v2376_v53 }
 0x41b   : > { %2607 = vmatpush1.bf16.msra.mxu0 %v2340_v12  ;;  %v2368_v61 = vpop.permute.xlu1 %2367 }
 0x41c   : > { %v2370_v50 = vpop.permute.xlu0 %2369  ;;  %3182 = vmatprep.subr.msk.bf16.mxu0 %vm1226_vm3, %v2334_v52 }
 0x41d   : > { %3199 = vmatprep.subr.msk.bf16.mxu1 %vm1300_vm5, %v2370_v50  ;;  %v2377_v34 = vsel %vm1300_vm5, %v2368_v61, %v2370_v50 }
 0x41e   : > { %3203 = vmatpush1.bf16.msra.mxu1 %v2377_v34 }
 0x41f   : > { %2609 = vmatpush1.bf16.msra.mxu0 %v2341_v8  ;;  %v2372_v21 = vpop.permute.xlu1 %2371 }
 0x420   : > { %v2374_v23 = vpop.permute.xlu0 %2373  ;;  %3183 = vmatprep.subr.msk.bf16.mxu0 %vm1226_vm3, %v2338_v19 }
 0x421   : > { %3200 = vmatprep.subr.msk.bf16.mxu1 %vm1300_vm5, %v2374_v23  ;;  %v2378_v32 = vsel %vm1300_vm5, %v2372_v21, %v2374_v23 }
 0x422   : > { %3204 = vmatpush1.bf16.msra.mxu1 %v2378_v32 }
 0x423   : > { %2611 = vmatpush1.bf16.msra.mxu0 %v2342_v27 }
 0x424   : > { %3184 = vmatprep.subr.msk.bf16.mxu0 %vm1300_vm5, %v2362_v49 }
 0x425   : > { %3191 = vmatmul.mubr.msk.bf16.vlgmr.msra.gmra.mrb[16].mxu1 %vm5043_vm6, %v3424_v54 }
 0x426   : > { %2613 = vmatmul.mubr.bf16.vlgmr.msra.gmra.mrb[32].mxu0 %v3412_v22 }
 0x427   : > { %2654 = vmatpush1.bf16.msra.mxu0 %v2375_v41  ;;  %2622 = vmatprep.mubr.bf16.mxu0 %v3415_v17 }
 0x428   : > { %3185 = vmatprep.subr.msk.bf16.mxu0 %vm1300_vm5, %v2366_v51 }
 0x42b   : > { %2656 = vmatpush1.bf16.msra.mxu0 %v2376_v53 }
 0x42c   : > { %3186 = vmatprep.subr.msk.bf16.mxu0 %vm1300_vm5, %v2370_v50 }
 0x42e   : > { %2623 = vmatmul.mubr.bf16.gmra.mrb[36].mxu0 %v3417_v57 }
 0x42f   : > { %2658 = vmatpush1.bf16.msra.mxu0 %v2377_v34  ;;  %2632 = vmatprep.mubr.bf16.mxu0 %v3418_v29 }
 0x430   : > { %3187 = vmatprep.subr.msk.bf16.mxu0 %vm1300_vm5, %v2374_v23  ;;  %vm5044_vm5 = vmmov %vm5043_vm6  ;;  %v2737_v10 = vpop.permute.xlu1 %2736 }
 0x431   : > { %vm5045_vm7 = vmmov %vm5044_vm5  ;;  %v2742_v20 = vpop.permute.xlu0 %2741 }
 0x432   : > { %vm5046_vm9 = vmmov %vm5044_vm5 }
 0x433   : > { %2660 = vmatpush1.bf16.msra.mxu0 %v2378_v32 }
 0x434   : > { %v4967_v46 = vpop.permute.xlu1 %2746 }
 0x435   : > { %v4969_v2 = vpop.permute.xlu0 %2751 }
 0x436   : > { %2633 = vmatmul.mubr.bf16.gmra.mrb[40].mxu0 %v3420_v30 }
 0x437   : > { %2642 = vmatprep.mubr.bf16.mxu0 %v3421_v13 }
 0x438   : > { %v4971_v28 = vpop.permute.xlu1 %2756 }
 0x439   : > { %v4973_v18 = vpop.permute.xlu0 %2761 }
 0x43c   : > { %v2767_v15 = vpop.permute.xlu1 %2766 }
 0x43d   : > { %v2772_v43 = vpop.permute.xlu0 %2771 }
 0x43e   : > { %2643 = vmatmul.mubr.bf16.gmra.mrb[44].mxu0 %v3423_v14 }
 0x43f   : > { %2685 = vmatprep.mubr.bf16.mxu0 %v3436_v3 }
 0x440   : > { %v2801_v24 = vpop.permute.xlu1 %2800 }
 0x441   : > { %v2806_v44 = vpop.permute.xlu0 %2805 }
 0x444   : > { %v2811_v36 = vpop.permute.xlu1 %2810 }
 0x445   : > { %v4975_v31 = vpop.permute.xlu0 %2815 }
 0x446   : > { %3188 = vmatmul.mubr.msk.bf16.vlgmr.msra.gmra.mrb[32].mxu0 %vm5044_vm5, %v3425_v9 }
 0x447   : > { %2695 = vmatprep.mubr.bf16.mxu0 %v3436_v3 }
 0x448   : > { %v4977_v45 = vpop.permute.xlu1 %2820 }
 0x449   : > { %v4979_v63 = vpop.permute.xlu0 %2825 }
 0x44c   : > { %v2831_v62 = vpop.permute.xlu1 %2830 }
 0x44d   : > { %v2836_v5 = vpop.permute.xlu0 %2835 }
 0x44e   : > { %3189 = vmatmul.mubr.msk.bf16.gmra.mrb[36].mxu0 %vm5045_vm7, %v3426_v6 }
 0x44f   : > { %2705 = vmatprep.mubr.bf16.mxu0 %v3436_v3 }
 0x456   : > { %3190 = vmatmul.mubr.msk.bf16.gmra.mrb[40].mxu0 %vm5046_vm9, %v3427_v16 }
 0x4f8   : > { %v2717_v4 = vpop.f32.mrb[16].mxu1 }
 0x4f9   : > { %v2719_v33 = vpop.f32.mrb[17].mxu1 }
 0x4fa   : > { %v2721_v3 = vpop.f32.mrb[18].mxu1 }
 0x4fb   : > { %v2723_v11 = vpop.f32.mrb[19].mxu1 }
 0x511   : > { %v2644_v25 = vpop.f32.mrb[44].mxu0 }
 0x512   : > { %v3221_v47 = vadd.f32 %v2717_v4, %v2644_v25  ;;  %v2646_v48 = vpop.f32.mrb[45].mxu0 }
 0x513   : > { %v3222_v42 = vadd.f32 %v2719_v33, %v2646_v48  ;;  %v2648_v56 = vpop.f32.mrb[46].mxu0 }
 0x514   : > { %v2786_v0 = vmul.f32 %v3221_v47, %v2767_v15  ;;  %v3223_v58 = vadd.f32 %v2721_v3, %v2648_v56  ;;  %v2650_v59 = vpop.f32.mrb[47].mxu0 }
 0x515   : > { %v2787_v1 = vmul.f32 %v3222_v42, %v2767_v15  ;;  %v3224_v35 = vadd.f32 %v2723_v11, %v2650_v59 }
 0x516   : > { %v2850_v60 = vadd.f32 %v2831_v62, %v2786_v0  ;;  %v2788_v26 = vmul.f32 %v3223_v58, %v2772_v43 }
 0x517   : > { %v2851_v52 = vadd.f32 %v2831_v62, %v2787_v1  ;;  %v2789_v7 = vmul.f32 %v3224_v35, %v2772_v43 }
 0x518   : > { %v2866_v55 = vmax.f32 %v2850_v60, 0.0  ;;  %v2852_v19 = vadd.f32 %v2836_v5, %v2788_v26 }
 0x519   : > { %v2867_v37 = vmax.f32 %v2851_v52, 0.0  ;;  %v2853_v38 = vadd.f32 %v2836_v5, %v2789_v7  ;;  %v2687_v49 = vpop.f32.mrb[32].mxu0 }
 0x51a   : > { %2882 = vst [vmem:[%s4985_s28 + $0x60] sm:$0xff] %v2866_v55  ;;  %v2868_v41 = vmax.f32 %v2852_v19, 0.0  ;;  %v2774_v39 = vmul.f32 %v2737_v10, %v2687_v49  ;;  %v2689_v40 = vpop.f32.mrb[33].mxu0 }
 0x51b   : > { %2883 = vst [vmem:[%s4985_s28 + $0x68] sm:$0xff] %v2867_v37  ;;  %v2869_v51 = vmax.f32 %v2853_v38, 0.0  ;;  %v2775_v53 = vmul.f32 %v2737_v10, %v2689_v40  ;;  %v2691_v12 = vpop.f32.mrb[34].mxu0 }
 0x51c   : > { %2884 = vst [vmem:[%s4985_s28 + $0x70] sm:$0xff] %v2868_v41  ;;  %v2838_v61 = vadd.f32 %v2801_v24, %v2774_v39  ;;  %v2776_v50 = vmul.f32 %v2742_v20, %v2691_v12  ;;  %v2693_v34 = vpop.f32.mrb[35].mxu0 }
 0x51d   : > { %2885 = vst [vmem:[%s4985_s28 + $0x78] sm:$0xff] %v2869_v51  ;;  %v2839_v8 = vadd.f32 %v2801_v24, %v2775_v53  ;;  %v2777_v21 = vmul.f32 %v2742_v20, %v2693_v34 }
 0x51e   : > { %v2854_v23 = vmax.f32 %v2838_v61, 0.0  ;;  %v2840_v32 = vadd.f32 %v2806_v44, %v2776_v50 }
 0x51f   : > { %v2855_v54 = vmax.f32 %v2839_v8, 0.0  ;;  %v2841_v27 = vadd.f32 %v2806_v44, %v2777_v21 }
 0x520   : > { %2870 = vst [vmem:[%s4985_s28] sm:$0xff] %v2854_v23  ;;  %v2856_v22 = vmax.f32 %v2840_v32, 0.0 }
 0x521   : > { %2871 = vst [vmem:[%s4985_s28 + $0x8] sm:$0xff] %v2855_v54  ;;  %v2857_v17 = vmax.f32 %v2841_v27, 0.0  ;;  %v2697_v57 = vpop.f32.mrb[36].mxu0 }
 0x522   : > { %2872 = vst [vmem:[%s4985_s28 + $0x10] sm:$0xff] %v2856_v22  ;;  %v2778_v29 = vmul.f32 %v4967_v46, %v2697_v57  ;;  %v2699_v30 = vpop.f32.mrb[37].mxu0 }
 0x523   : > { %2873 = vst [vmem:[%s4985_s28 + $0x18] sm:$0xff] %v2857_v17  ;;  %v2779_v13 = vmul.f32 %v4967_v46, %v2699_v30  ;;  %v2701_v14 = vpop.f32.mrb[38].mxu0 }
 0x524   : > { %v2842_v9 = vadd.f32 %v2811_v36, %v2778_v29  ;;  %v2780_v6 = vmul.f32 %v4969_v2, %v2701_v14  ;;  %v2703_v16 = vpop.f32.mrb[39].mxu0 }
 0x525   : > { %v2843_v10 = vadd.f32 %v2811_v36, %v2779_v13  ;;  %v2781_v20 = vmul.f32 %v4969_v2, %v2703_v16 }
 0x526   : > { %v2858_v4 = vmax.f32 %v2842_v9, 0.0  ;;  %v2844_v33 = vadd.f32 %v4975_v31, %v2780_v6 }
 0x527   : > { %v2859_v3 = vmax.f32 %v2843_v10, 0.0  ;;  %v2845_v11 = vadd.f32 %v4975_v31, %v2781_v20 }
 0x528   : > { %2874 = vst [vmem:[%s4985_s28 + $0x20] sm:$0xff] %v2858_v4  ;;  %v2860_v15 = vmax.f32 %v2844_v33, 0.0 }
 0x529   : > { %2875 = vst [vmem:[%s4985_s28 + $0x28] sm:$0xff] %v2859_v3  ;;  %v2861_v46 = vmax.f32 %v2845_v11, 0.0  ;;  %v2707_v43 = vpop.f32.mrb[40].mxu0 }
 0x52a   : > { %2876 = vst [vmem:[%s4985_s28 + $0x30] sm:$0xff] %v2860_v15  ;;  %v2782_v24 = vmul.f32 %v4971_v28, %v2707_v43  ;;  %v2709_v44 = vpop.f32.mrb[41].mxu0 }
 0x52b   : > { %2877 = vst [vmem:[%s4985_s28 + $0x38] sm:$0xff] %v2861_v46  ;;  %v2783_v2 = vmul.f32 %v4971_v28, %v2709_v44  ;;  %v2711_v36 = vpop.f32.mrb[42].mxu0 }
 0x52c   : > { %v2846_v25 = vadd.f32 %v4977_v45, %v2782_v24  ;;  %v2784_v31 = vmul.f32 %v4973_v18, %v2711_v36  ;;  %v2713_v47 = vpop.f32.mrb[43].mxu0 }
 0x52d   : > { %v2847_v48 = vadd.f32 %v4977_v45, %v2783_v2  ;;  %v2785_v42 = vmul.f32 %v4973_v18, %v2713_v47 }
 0x52e   : > { %v2862_v56 = vmax.f32 %v2846_v25, 0.0  ;;  %v2848_v0 = vadd.f32 %v4979_v63, %v2784_v31 }
 0x52f   : > { %v2863_v58 = vmax.f32 %v2847_v48, 0.0  ;;  %v2849_v59 = vadd.f32 %v4979_v63, %v2785_v42 }
 0x530   : > { %2878 = vst [vmem:[%s4985_s28 + $0x40] sm:$0xff] %v2862_v56  ;;  %v2864_v62 = vmax.f32 %v2848_v0, 0.0 }
 0x531   : > { %2879 = vst [vmem:[%s4985_s28 + $0x48] sm:$0xff] %v2863_v58  ;;  %v2865_v28 = vmax.f32 %v2849_v59, 0.0 }
 0x532   : > { %2880 = vst [vmem:[%s4985_s28 + $0x50] sm:$0xff] %v2864_v62 }
 0x533   : > { %2881 = vst [vmem:[%s4985_s28 + $0x58] sm:$0xff] %v2865_v28 }
 0x534 PF: > { %s19_s30 = sadd.s32 1, %s3434_s30  }
 0x535   : > { %p16_p4 = scmp.ge.s32.totalorder %s19_s30, 4  }
 0x537   :  { %18 = sbr.rel (!%p16_p4) target bundleno = 1 (0x1), region = 89 }

</bundles_post_ra>
